<compile_context>
chip_gen: v6e
topology: v6e:2x2x1
jax: 0.10.0
libtpu: 0.0.40
codegen_flags: <defaults>
</compile_context>

<pallas_src>
import math

import jax
import jax.numpy as jnp
import numpy as np
from jax.experimental import pallas as pl
from jax.experimental.pallas import tpu as pltpu


def _vmem_capacity_bytes() -> int:
    """Physical per-core VMEM; conservative fallback (v7x: 64 MiB) when unqueryable."""
    try:
        cap = int(pltpu.get_tpu_info().vmem_capacity_bytes)
        if cap > 0:
            return cap
    except Exception:
        pass
    return 64 << 20


def _const_block_spec(shape, single_buffer: bool) -> pl.BlockSpec:
    """Spec for a block-index-invariant operand (weights / biases).

    When supported, request single buffering: default double buffering would keep a
    useless second copy of every weight resident in VMEM (~16 MiB wasted at D=1024 f32).
    """
    imap = lambda b, qi: (0, 0)
    if single_buffer:
        try:
            return pl.BlockSpec(shape, imap, pipeline_mode=pl.Buffered(1))
        except Exception:   # pipeline_mode / Buffered unavailable on this jax version
            pass
    return pl.BlockSpec(shape, imap)


def _make_mha_kernel(*, h: int, d_k: int, mode: str, use_mask: bool, compute_dtype):
    """mode: 'kv' (key is value -> fused KV projection), 'general' (distinct k/v)."""
    d_model = h * d_k
    inv_sqrt_dk = float(1.0 / math.sqrt(d_k))      # Python float -> literal, not a captured const
    cdt = compute_dtype

    def attend_tile(q_f32, mask_ref, wo_t_ref, bo_ref, out_ref, kt_ref, vproj_ref):
        # q_f32: (tq, D) f32 accumulator from the Q projection.
        qc = q_f32.astype(cdt)
        if use_mask:
            # Hoisted out of the head loop: one (tq, Sk) load + compare for all heads.
            masked = mask_ref[0] != 0

        out_acc = None
        for head in range(h):                       # h is static -> unrolled
            lo = head * d_k
            hi = lo + d_k
            # kT / Wo^T head slices are sublane (row) slices -> cheap; no per-head transpose.
            s = jnp.dot(qc[:, lo:hi], kt_ref[lo:hi, :],
                        preferred_element_type=jnp.float32) * inv_sqrt_dk
            if use_mask:
                s = jnp.where(masked, -1e9, s)
            # softmax over keys, kept in f32; reciprocal goes to the EUP slot.
            s = s - jnp.max(s, axis=-1, keepdims=True)
            p = jnp.exp(s)
            p = p * pl.reciprocal(jnp.sum(p, axis=-1, keepdims=True), approx=True)

            ctx_h = jnp.dot(p.astype(cdt), vproj_ref[:, lo:hi],
                            preferred_element_type=jnp.float32)
            # Accumulate this head's contribution to the output projection directly:
            # concat(ctx_heads) @ Wo^T == sum_head ctx_h @ Wo^T[lo:hi, :].
            contrib = jnp.dot(ctx_h.astype(cdt), wo_t_ref[lo:hi, :],
                              preferred_element_type=jnp.float32)
            out_acc = contrib if out_acc is None else out_acc + contrib

        out_ref[0] = (out_acc + bo_ref[...]).astype(out_ref.dtype)

    if mode == "kv":
        def kernel(*refs):
            if use_mask:
                (xq_ref, xkv_ref, mask_ref, wq_t_ref, bq_ref, wkv_t_ref, bkv_ref,
                 wo_t_ref, bo_ref, out_ref, kt_ref, vproj_ref) = refs
            else:
                (xq_ref, xkv_ref, wq_t_ref, bq_ref, wkv_t_ref, bkv_ref,
                 wo_t_ref, bo_ref, out_ref, kt_ref, vproj_ref) = refs
                mask_ref = None

            # Project K/V only once per batch element; reuse for all q-tiles.
            @pl.when(pl.program_id(1) == 0)
            def _project_kv():
                kv = jnp.dot(xkv_ref[0], wkv_t_ref[...],
                             preferred_element_type=jnp.float32) + bkv_ref[...]
                kt_ref[...] = kv[:, :d_model].T.astype(cdt)    # one transpose per batch
                vproj_ref[...] = kv[:, d_model:].astype(cdt)

            q = jnp.dot(xq_ref[0], wq_t_ref[...],
                        preferred_element_type=jnp.float32) + bq_ref[...]
            attend_tile(q, mask_ref, wo_t_ref, bo_ref, out_ref, kt_ref, vproj_ref)

    else:   # general: distinct key / value tensors
        def kernel(*refs):
            if use_mask:
                (xq_ref, xk_ref, xv_ref, mask_ref, wq_t_ref, bq_ref, wk_t_ref, bk_ref,
                 wv_t_ref, bv_ref, wo_t_ref, bo_ref, out_ref, kt_ref, vproj_ref) = refs
            else:
                (xq_ref, xk_ref, xv_ref, wq_t_ref, bq_ref, wk_t_ref, bk_ref,
                 wv_t_ref, bv_ref, wo_t_ref, bo_ref, out_ref, kt_ref, vproj_ref) = refs
                mask_ref = None

            @pl.when(pl.program_id(1) == 0)
            def _project_kv():
                k = jnp.dot(xk_ref[0], wk_t_ref[...],
                            preferred_element_type=jnp.float32) + bk_ref[...]
                v = jnp.dot(xv_ref[0], wv_t_ref[...],
                            preferred_element_type=jnp.float32) + bv_ref[...]
                kt_ref[...] = k.T.astype(cdt)
                vproj_ref[...] = v.astype(cdt)

            q = jnp.dot(xq_ref[0], wq_t_ref[...],
                        preferred_element_type=jnp.float32) + bq_ref[...]
            attend_tile(q, mask_ref, wo_t_ref, bo_ref, out_ref, kt_ref, vproj_ref)

    return kernel


def multi_headed_attention(params, query, key, value, mask=None, *, h: int,
                           q_tile=None, compute_dtype=jnp.float32):
    """Pallas-backed forward pass matching MultiHeadedAttention.forward (dropout=0).

    query: [B, Sq, d_model]; key/value: [B, Sk, d_model];
    mask (optional): [B, Sq, Sk], True/nonzero = masked out (broadcast over heads).
    compute_dtype: matmul operand dtype. bf16 is recommended on ALL TPU generations
    (the v5e MXU is bf16-native too); accumulation and softmax stay in f32.
    """
    B, Sq, D = query.shape
    Sk = key.shape[1]
    assert D % h == 0
    assert key.shape == (B, Sk, D) and value.shape == (B, Sk, D)
    if mask is not None:
        assert mask.shape == (B, Sq, Sk)
    d_k = D // h
    use_mask = mask is not None
    out_dtype = query.dtype
    cdt = compute_dtype

    cap = _vmem_capacity_bytes()

    # Bigger q-tiles amortize per-step overhead (~0.35us) and weight residency; the
    # 64 MiB v7x budget gets a smaller default. Sweep q_tile for production shapes.
    if q_tile is None:
        q_tile = 256 if cap > (96 << 20) else 128
    tq = int(min(q_tile, Sq))
    nq = pl.cdiv(Sq, tq)

    mode = "kv" if key is value else "general"
    kernel = _make_mha_kernel(h=h, d_k=d_k, mode=mode, use_mask=use_mask,
                              compute_dtype=cdt)

    # PyTorch nn.Linear: y = x @ W.T + b -> pre-transpose (and downcast) weights on the
    # host so no DxD transposes go through the XLU in-kernel; biases stay f32.
    wqT = params["wq"].T.astype(cdt)
    woT = params["wo"].T.astype(cdt)
    bq = params["bq"].reshape(1, D).astype(jnp.float32)
    bo = params["bo"].reshape(1, D).astype(jnp.float32)

    tile_q_spec = pl.BlockSpec((1, tq, D), lambda b, qi: (b, qi, 0))
    full_kv_spec = pl.BlockSpec((1, Sk, D), lambda b, qi: (b, 0, 0))

    args = [query.astype(cdt)]
    data_specs = [tile_q_spec]
    if mode == "kv":
        args.append(key.astype(cdt))
        data_specs.append(full_kv_spec)
    else:
        args += [key.astype(cdt), value.astype(cdt)]
        data_specs += [full_kv_spec, full_kv_spec]
    if use_mask:
        # int8 mask: 4x less HBM traffic than int32 for the (tq, Sk) block per step.
        args.append(mask.astype(jnp.int8))
        data_specs.append(pl.BlockSpec((1, tq, Sk), lambda b, qi: (b, qi, 0)))

    if mode == "kv":
        wkvT = jnp.concatenate([params["wk"].T, params["wv"].T], axis=1).astype(cdt)
        bkv = jnp.concatenate([params["bk"], params["bv"]]).reshape(1, 2 * D).astype(jnp.float32)
        weight_args = [wqT, bq, wkvT, bkv, woT, bo]
    else:
        wkT = params["wk"].T.astype(cdt)
        wvT = params["wv"].T.astype(cdt)
        bk = params["bk"].reshape(1, D).astype(jnp.float32)
        bv = params["bv"].reshape(1, D).astype(jnp.float32)
        weight_args = [wqT, bq, wkT, bk, wvT, bv, woT, bo]
    args += weight_args

    # VMEM budget: pipelined blocks + scratch + rough f32 intermediates, capped at 85%
    # of *physical* VMEM (never above capacity -> safe on v7x's 64 MiB).
    csize = jnp.dtype(cdt).itemsize
    osize = jnp.dtype(out_dtype).itemsize
    n_kv_in = 1 if mode == "kv" else 2
    blk = 2 * (tq * D * csize + n_kv_in * Sk * D * csize + tq * D * osize)
    if use_mask:
        blk += 2 * tq * Sk                                  # int8 mask tile
    blk += 2 * (4 * D * D * csize + 4 * D * 4)              # weights (worst case 2x) + biases
    scratch_bytes = 2 * Sk * D * csize                      # projected K^T + V scratch
    interm = 4 * (3 * tq * D + 2 * tq * Sk + 2 * Sk * D)    # f32 temporaries (rough)
    need = blk + scratch_bytes + interm + (4 << 20)
    vmem_limit = int(min(max(need, 32 << 20), int(cap * 0.85)))

    out_spec = pl.BlockSpec((1, tq, D), lambda b, qi: (b, qi, 0))
    scratch_shapes = [pltpu.VMEM((D, Sk), cdt),             # projected K, stored transposed
                      pltpu.VMEM((Sk, D), cdt)]             # projected V

    def run(single_buffer_consts: bool):
        in_specs = list(data_specs) + [
            _const_block_spec(tuple(w.shape), single_buffer_consts) for w in weight_args]
        return pl.pallas_call(
            kernel,
            out_shape=jax.ShapeDtypeStruct((B, Sq, D), out_dtype),
            grid_spec=pltpu.PrefetchScalarGridSpec(
                num_scalar_prefetch=0,
                grid=(B, nq),
                in_specs=in_specs,
                out_specs=out_spec,
                scratch_shapes=scratch_shapes,
            ),
            compiler_params=pltpu.CompilerParams(
                # qi MUST be "arbitrary": projected K/V live in scratch and are only
                # recomputed at qi == 0 for each batch element. B stays "parallel" so the
                # grid shards across v7x's two TensorCores (near-zero effect on v5e/v6e).
                dimension_semantics=("parallel", "arbitrary"),
                vmem_limit_bytes=vmem_limit,
            ),
        )(*args)

    try:
        return run(True)
    except Exception:
        # pl.Buffered(1) / pipeline_mode unsupported on this jax/backend:
        # retry with default double-buffered constant blocks.
        return run(False)


def _reference_mha(params, query, key, value, mask=None, *, h: int):
    """Pure-JAX reference mirroring the PyTorch forward (dropout=0)."""
    B, Sq, D = query.shape
    d_k = D // h

    def lin(x, w, b):
        return x @ w.T + b

    q = lin(query, params["wq"], params["bq"]).reshape(B, -1, h, d_k).transpose(0, 2, 1, 3)
    k = lin(key, params["wk"], params["bk"]).reshape(B, -1, h, d_k).transpose(0, 2, 1, 3)
    v = lin(value, params["wv"], params["bv"]).reshape(B, -1, h, d_k).transpose(0, 2, 1, 3)

    scores = jnp.einsum("bhqd,bhkd->bhqk", q, k) / math.sqrt(d_k)
    if mask is not None:
        scores = jnp.where(mask[:, None, :, :], -1e9, scores)
    p = jax.nn.softmax(scores, axis=-1)
    x = jnp.einsum("bhqk,bhkd->bhqd", p, v)
    x = x.transpose(0, 2, 1, 3).reshape(B, -1, h * d_k)
    return lin(x, params["wo"], params["bo"])


def _init_params(key, d_model):
    """Deterministic synthetic parameters (4x nn.Linear(d_model, d_model))."""
    ks = jax.random.split(key, 8)
    scale = 1.0 / math.sqrt(d_model)

    def w(k):
        return jax.random.normal(k, (d_model, d_model), dtype=jnp.float32) * scale

    def b(k):
        return jax.random.normal(k, (d_model,), dtype=jnp.float32) * scale

    return {
        "wq": w(ks[0]), "bq": b(ks[1]),
        "wk": w(ks[2]), "bk": b(ks[3]),
        "wv": w(ks[4]), "bv": b(ks[5]),
        "wo": w(ks[6]), "bo": b(ks[7]),
    }


if __name__ == "__main__":
    B, S, d_model, h = 2, 8, 32, 4

    root = jax.random.PRNGKey(0)
    k_params, k_q, k_k, k_v, k_m, k_x, k_q2, k_m2 = jax.random.split(root, 8)

    params = _init_params(k_params, d_model)
    query = jax.random.normal(k_q, (B, S, d_model), dtype=jnp.float32)
    key_in = jax.random.normal(k_k, (B, S, d_model), dtype=jnp.float32)
    value = jax.random.normal(k_v, (B, S, d_model), dtype=jnp.float32)
    x_self = jax.random.normal(k_x, (B, S, d_model), dtype=jnp.float32)
    mask = jax.random.bernoulli(k_m, p=0.25, shape=(B, S, S))       # True = masked out

    def check(out, ref, rtol, atol):
        np.testing.assert_allclose(np.asarray(out, dtype=np.float32),
                                   np.asarray(ref, dtype=np.float32),
                                   rtol=rtol, atol=atol)

    # 1) general cross-attention (distinct q/k/v), masked, f32 compute
    out = jax.block_until_ready(
        multi_headed_attention(params, query, key_in, value, mask=mask, h=h))
    check(out, _reference_mha(params, query, key_in, value, mask=mask, h=h), 1e-2, 1e-2)

    # 2) general, no mask (module default call), f32 compute
    out = jax.block_until_ready(
        multi_headed_attention(params, query, key_in, value, h=h))
    check(out, _reference_mha(params, query, key_in, value, h=h), 1e-2, 1e-2)

    # 3) self-attention (query is key is value -> fused KV projection path), masked, f32
    out = jax.block_until_ready(
        multi_headed_attention(params, x_self, x_self, x_self, mask=mask, h=h))
    check(out, _reference_mha(params, x_self, x_self, x_self, mask=mask, h=h), 1e-2, 1e-2)

    # 4) encoder-decoder style (key is value != query -> fused KV projection), masked, bf16
    out = jax.block_until_ready(
        multi_headed_attention(params, query, x_self, x_self, mask=mask, h=h,
                               compute_dtype=jnp.bfloat16))
    check(out, _reference_mha(params, query, x_self, x_self, mask=mask, h=h), 7e-2, 7e-2)

    # 5) multi q-tile (Sq=16, q_tile=8 -> nq=2): exercises the K/V-projection-in-scratch
    #    reuse across q-tiles of the same batch element.
    Sq2 = 2 * S
    query2 = jax.random.normal(k_q2, (B, Sq2, d_model), dtype=jnp.float32)
    mask2 = jax.random.bernoulli(k_m2, p=0.25, shape=(B, Sq2, S))
    out = jax.block_until_ready(
        multi_headed_attention(params, query2, key_in, value, mask=mask2, h=h, q_tile=8))
    check(out, _reference_mha(params, query2, key_in, value, mask=mask2, h=h), 1e-2, 1e-2)

    print("KERNEL_OK")
</pallas_src>

<mosaic_0001>
module attributes {stable_mosaic.version = 11 : i64} {
  func.func @kernel(%arg0: i32, %arg1: i32, %arg2: memref<1x8x32xf32, #tpu.memory_space<vmem>>, %arg3: memref<1x8x32xf32, #tpu.memory_space<vmem>>, %arg4: memref<1x8x32xf32, #tpu.memory_space<vmem>>, %arg5: memref<1x8x8xi8, #tpu.memory_space<vmem>>, %arg6: memref<32x32xf32, #tpu.memory_space<vmem>>, %arg7: memref<1x32xf32, #tpu.memory_space<vmem>>, %arg8: memref<32x32xf32, #tpu.memory_space<vmem>>, %arg9: memref<1x32xf32, #tpu.memory_space<vmem>>, %arg10: memref<32x32xf32, #tpu.memory_space<vmem>>, %arg11: memref<1x32xf32, #tpu.memory_space<vmem>>, %arg12: memref<32x32xf32, #tpu.memory_space<vmem>>, %arg13: memref<1x32xf32, #tpu.memory_space<vmem>>, %arg14: memref<1x8x32xf32, #tpu.memory_space<vmem>>, %arg15: memref<32x8xf32, #tpu.memory_space<vmem>>, %arg16: memref<8x32xf32, #tpu.memory_space<vmem>>) attributes {dimension_semantics = [#tpu.dimension_semantics<parallel>, #tpu.dimension_semantics<arbitrary>], iteration_bounds = array<i64: 2, 1>, scalar_prefetch = 0 : i64, scratch_operands = 2 : i64, tpu.core_type = #tpu.core_type<tc>, window_params = [{transform_indices = @transform_0, window_bounds = array<i64: 1, 8, 32>}, {transform_indices = @transform_1, window_bounds = array<i64: 1, 8, 32>}, {transform_indices = @transform_2, window_bounds = array<i64: 1, 8, 32>}, {transform_indices = @transform_3, window_bounds = array<i64: 1, 8, 8>}, {pipeline_mode = #tpu.pipeline_mode<synchronous>, transform_indices = @transform_4, window_bounds = array<i64: 32, 32>}, {pipeline_mode = #tpu.pipeline_mode<synchronous>, transform_indices = @transform_5, window_bounds = array<i64: 1, 32>}, {pipeline_mode = #tpu.pipeline_mode<synchronous>, transform_indices = @transform_6, window_bounds = array<i64: 32, 32>}, {pipeline_mode = #tpu.pipeline_mode<synchronous>, transform_indices = @transform_7, window_bounds = array<i64: 1, 32>}, {pipeline_mode = #tpu.pipeline_mode<synchronous>, transform_indices = @transform_8, window_bounds = array<i64: 32, 32>}, {pipeline_mode = #tpu.pipeline_mode<synchronous>, transform_indices = @transform_9, window_bounds = array<i64: 1, 32>}, {pipeline_mode = #tpu.pipeline_mode<synchronous>, transform_indices = @transform_10, window_bounds = array<i64: 32, 32>}, {pipeline_mode = #tpu.pipeline_mode<synchronous>, transform_indices = @transform_11, window_bounds = array<i64: 1, 32>}, {transform_indices = @transform_12, window_bounds = array<i64: 1, 8, 32>}]} {
    %c0_i32 = arith.constant 0 : i32
    %0 = arith.cmpi eq, %arg1, %c0_i32 : i32
    %1 = arith.extui %0 : i1 to i32
    %c0_i32_0 = arith.constant 0 : i32
    %2 = arith.cmpi ne, %1, %c0_i32_0 : i32
    scf.if %2 {
      %c0_64 = arith.constant 0 : index
      %c0_65 = arith.constant 0 : index
      %c0_66 = arith.constant 0 : index
      %107 = vector.load %arg3[%c0_64, %c0_65, %c0_66] : memref<1x8x32xf32, #tpu.memory_space<vmem>>, vector<1x8x32xf32>
      %108 = vector.shape_cast %107 : vector<1x8x32xf32> to vector<8x32xf32>
      %c0_67 = arith.constant 0 : index
      %c0_68 = arith.constant 0 : index
      %109 = vector.load %arg8[%c0_67, %c0_68] : memref<32x32xf32, #tpu.memory_space<vmem>>, vector<32x32xf32>
      %cst_69 = arith.constant dense<0.000000e+00> : vector<8x32xf32>
      %110 = tpu.matmul %108, %109, %cst_69 {dimension_numbers = #tpu.dot_dimension_numbers<[1], [0], [0], [1], [0, 0, 1, 1], [], []>} : vector<8x32xf32>, vector<32x32xf32>, vector<8x32xf32> -> vector<8x32xf32>
      %c0_70 = arith.constant 0 : index
      %c0_71 = arith.constant 0 : index
      %111 = vector.load %arg9[%c0_70, %c0_71] : memref<1x32xf32, #tpu.memory_space<vmem>>, vector<1x32xf32>
      %112 = vector.broadcast %111 : vector<1x32xf32> to vector<8x32xf32>
      %113 = arith.addf %110, %112 : vector<8x32xf32>
      %c0_72 = arith.constant 0 : index
      %c0_73 = arith.constant 0 : index
      %c0_74 = arith.constant 0 : index
      %114 = vector.load %arg4[%c0_72, %c0_73, %c0_74] : memref<1x8x32xf32, #tpu.memory_space<vmem>>, vector<1x8x32xf32>
      %115 = vector.shape_cast %114 : vector<1x8x32xf32> to vector<8x32xf32>
      %c0_75 = arith.constant 0 : index
      %c0_76 = arith.constant 0 : index
      %116 = vector.load %arg10[%c0_75, %c0_76] : memref<32x32xf32, #tpu.memory_space<vmem>>, vector<32x32xf32>
      %cst_77 = arith.constant dense<0.000000e+00> : vector<8x32xf32>
      %117 = tpu.matmul %115, %116, %cst_77 {dimension_numbers = #tpu.dot_dimension_numbers<[1], [0], [0], [1], [0, 0, 1, 1], [], []>} : vector<8x32xf32>, vector<32x32xf32>, vector<8x32xf32> -> vector<8x32xf32>
      %c0_78 = arith.constant 0 : index
      %c0_79 = arith.constant 0 : index
      %118 = vector.load %arg11[%c0_78, %c0_79] : memref<1x32xf32, #tpu.memory_space<vmem>>, vector<1x32xf32>
      %119 = vector.broadcast %118 : vector<1x32xf32> to vector<8x32xf32>
      %120 = arith.addf %117, %119 : vector<8x32xf32>
      %121 = tpu.transpose %113, [1, 0] : vector<8x32xf32> -> vector<32x8xf32>
      %c0_80 = arith.constant 0 : index
      %c0_81 = arith.constant 0 : index
      %122 = vector.load %arg15[%c0_80, %c0_81] : memref<32x8xf32, #tpu.memory_space<vmem>>, vector<32x8xf32>
      tpu.vector_store %arg15[%c0_80, %c0_81], %121 {strides = array<i32>} : memref<32x8xf32, #tpu.memory_space<vmem>>, vector<32x8xf32>,
      %c0_82 = arith.constant 0 : index
      %c0_83 = arith.constant 0 : index
      %123 = vector.load %arg16[%c0_82, %c0_83] : memref<8x32xf32, #tpu.memory_space<vmem>>, vector<8x32xf32>
      tpu.vector_store %arg16[%c0_82, %c0_83], %120 {strides = array<i32>} : memref<8x32xf32, #tpu.memory_space<vmem>>, vector<8x32xf32>,
    } else {
    }
    %c0 = arith.constant 0 : index
    %c0_1 = arith.constant 0 : index
    %c0_2 = arith.constant 0 : index
    %3 = vector.load %arg2[%c0, %c0_1, %c0_2] : memref<1x8x32xf32, #tpu.memory_space<vmem>>, vector<1x8x32xf32>
    %4 = vector.shape_cast %3 : vector<1x8x32xf32> to vector<8x32xf32>
    %c0_3 = arith.constant 0 : index
    %c0_4 = arith.constant 0 : index
    %5 = vector.load %arg6[%c0_3, %c0_4] : memref<32x32xf32, #tpu.memory_space<vmem>>, vector<32x32xf32>
    %cst = arith.constant dense<0.000000e+00> : vector<8x32xf32>
    %6 = tpu.matmul %4, %5, %cst {dimension_numbers = #tpu.dot_dimension_numbers<[1], [0], [0], [1], [0, 0, 1, 1], [], []>} : vector<8x32xf32>, vector<32x32xf32>, vector<8x32xf32> -> vector<8x32xf32>
    %c0_5 = arith.constant 0 : index
    %c0_6 = arith.constant 0 : index
    %7 = vector.load %arg7[%c0_5, %c0_6] : memref<1x32xf32, #tpu.memory_space<vmem>>, vector<1x32xf32>
    %8 = vector.broadcast %7 : vector<1x32xf32> to vector<8x32xf32>
    %9 = arith.addf %6, %8 : vector<8x32xf32>
    %c0_7 = arith.constant 0 : index
    %c0_8 = arith.constant 0 : index
    %c0_9 = arith.constant 0 : index
    %10 = vector.load %arg5[%c0_7, %c0_8, %c0_9] : memref<1x8x8xi8, #tpu.memory_space<vmem>>, vector<1x8x8xi8>
    %11 = vector.shape_cast %10 : vector<1x8x8xi8> to vector<8x8xi8>
    %c0_i8 = arith.constant 0 : i8
    %12 = vector.broadcast %c0_i8 : i8 to vector<8x8xi8>
    %13 = arith.cmpi ne, %11, %12 : vector<8x8xi8>
    %14 = vector.extract_strided_slice %9 {offsets = [0, 0], sizes = [8, 8], strides = [1, 1]} : vector<8x32xf32> to vector<8x8xf32>
    %c0_10 = arith.constant 0 : index
    %c0_11 = arith.constant 0 : index
    %15 = vector.load %arg15[%c0_10, %c0_11] : memref<32x8xf32, #tpu.memory_space<vmem>>, vector<8x8xf32>
    %cst_12 = arith.constant dense<0.000000e+00> : vector<8x8xf32>
    %16 = tpu.matmul %14, %15, %cst_12 {dimension_numbers = #tpu.dot_dimension_numbers<[1], [0], [0], [1], [0, 0, 1, 1], [], []>} : vector<8x8xf32>, vector<8x8xf32>, vector<8x8xf32> -> vector<8x8xf32>
    %cst_13 = arith.constant 0.353553385 : f32
    %17 = vector.broadcast %cst_13 : f32 to vector<8x8xf32>
    %18 = arith.mulf %16, %17 : vector<8x8xf32>
    %cst_14 = arith.constant -1.000000e+09 : f32
    %19 = vector.broadcast %cst_14 : f32 to vector<8x8xf32>
    %20 = arith.select %13, %19, %18 : vector<8x8xi1>, vector<8x8xf32>
    %cst_15 = arith.constant dense<0xFF800000> : vector<8xf32>
    %21 = vector.multi_reduction <maximumf>, %20, %cst_15 [1] : vector<8x8xf32> to vector<8xf32>
    %22 = vector.shape_cast %21 : vector<8xf32> to vector<8x1xf32>
    %23 = vector.broadcast %22 : vector<8x1xf32> to vector<8x8xf32>
    %24 = arith.subf %20, %23 : vector<8x8xf32>
    %25 = math.exp %24 : vector<8x8xf32>
    %cst_16 = arith.constant dense<0.000000e+00> : vector<8xf32>
    %26 = vector.multi_reduction <add>, %25, %cst_16 [1] : vector<8x8xf32> to vector<8xf32>
    %27 = vector.shape_cast %26 : vector<8xf32> to vector<8x1xf32>
    %28 = tpu.reciprocal %27 {approx = true} : vector<8x1xf32> -> vector<8x1xf32>
    %29 = vector.broadcast %28 : vector<8x1xf32> to vector<8x8xf32>
    %30 = arith.mulf %25, %29 : vector<8x8xf32>
    %c0_17 = arith.constant 0 : index
    %c0_18 = arith.constant 0 : index
    %31 = vector.load %arg16[%c0_17, %c0_18] : memref<8x32xf32, #tpu.memory_space<vmem>>, vector<8x8xf32>
    %cst_19 = arith.constant dense<0.000000e+00> : vector<8x8xf32>
    %32 = tpu.matmul %30, %31, %cst_19 {dimension_numbers = #tpu.dot_dimension_numbers<[1], [0], [0], [1], [0, 0, 1, 1], [], []>} : vector<8x8xf32>, vector<8x8xf32>, vector<8x8xf32> -> vector<8x8xf32>
    %c0_20 = arith.constant 0 : index
    %c0_21 = arith.constant 0 : index
    %33 = vector.load %arg12[%c0_20, %c0_21] : memref<32x32xf32, #tpu.memory_space<vmem>>, vector<8x32xf32>
    %cst_22 = arith.constant dense<0.000000e+00> : vector<8x32xf32>
    %34 = tpu.matmul %32, %33, %cst_22 {dimension_numbers = #tpu.dot_dimension_numbers<[1], [0], [0], [1], [0, 0, 1, 1], [], []>} : vector<8x8xf32>, vector<8x32xf32>, vector<8x32xf32> -> vector<8x32xf32>
    %35 = vector.extract_strided_slice %9 {offsets = [0, 8], sizes = [8, 8], strides = [1, 1]} : vector<8x32xf32> to vector<8x8xf32>
    %c8 = arith.constant 8 : index
    %c0_23 = arith.constant 0 : index
    %36 = vector.load %arg15[%c8, %c0_23] : memref<32x8xf32, #tpu.memory_space<vmem>>, vector<8x8xf32>
    %cst_24 = arith.constant dense<0.000000e+00> : vector<8x8xf32>
    %37 = tpu.matmul %35, %36, %cst_24 {dimension_numbers = #tpu.dot_dimension_numbers<[1], [0], [0], [1], [0, 0, 1, 1], [], []>} : vector<8x8xf32>, vector<8x8xf32>, vector<8x8xf32> -> vector<8x8xf32>
    %cst_25 = arith.constant 0.353553385 : f32
    %38 = vector.broadcast %cst_25 : f32 to vector<8x8xf32>
    %39 = arith.mulf %37, %38 : vector<8x8xf32>
    %cst_26 = arith.constant -1.000000e+09 : f32
    %40 = vector.broadcast %cst_26 : f32 to vector<8x8xf32>
    %41 = arith.select %13, %40, %39 : vector<8x8xi1>, vector<8x8xf32>
    %cst_27 = arith.constant dense<0xFF800000> : vector<8xf32>
    %42 = vector.multi_reduction <maximumf>, %41, %cst_27 [1] : vector<8x8xf32> to vector<8xf32>
    %43 = vector.shape_cast %42 : vector<8xf32> to vector<8x1xf32>
    %44 = vector.broadcast %43 : vector<8x1xf32> to vector<8x8xf32>
    %45 = arith.subf %41, %44 : vector<8x8xf32>
    %46 = math.exp %45 : vector<8x8xf32>
    %cst_28 = arith.constant dense<0.000000e+00> : vector<8xf32>
    %47 = vector.multi_reduction <add>, %46, %cst_28 [1] : vector<8x8xf32> to vector<8xf32>
    %48 = vector.shape_cast %47 : vector<8xf32> to vector<8x1xf32>
    %49 = tpu.reciprocal %48 {approx = true} : vector<8x1xf32> -> vector<8x1xf32>
    %50 = vector.broadcast %49 : vector<8x1xf32> to vector<8x8xf32>
    %51 = arith.mulf %46, %50 : vector<8x8xf32>
    %c0_29 = arith.constant 0 : index
    %c8_30 = arith.constant 8 : index
    %52 = vector.load %arg16[%c0_29, %c8_30] : memref<8x32xf32, #tpu.memory_space<vmem>>, vector<8x8xf32>
    %cst_31 = arith.constant dense<0.000000e+00> : vector<8x8xf32>
    %53 = tpu.matmul %51, %52, %cst_31 {dimension_numbers = #tpu.dot_dimension_numbers<[1], [0], [0], [1], [0, 0, 1, 1], [], []>} : vector<8x8xf32>, vector<8x8xf32>, vector<8x8xf32> -> vector<8x8xf32>
    %c8_32 = arith.constant 8 : index
    %c0_33 = arith.constant 0 : index
    %54 = vector.load %arg12[%c8_32, %c0_33] : memref<32x32xf32, #tpu.memory_space<vmem>>, vector<8x32xf32>
    %cst_34 = arith.constant dense<0.000000e+00> : vector<8x32xf32>
    %55 = tpu.matmul %53, %54, %cst_34 {dimension_numbers = #tpu.dot_dimension_numbers<[1], [0], [0], [1], [0, 0, 1, 1], [], []>} : vector<8x8xf32>, vector<8x32xf32>, vector<8x32xf32> -> vector<8x32xf32>
    %56 = arith.addf %34, %55 : vector<8x32xf32>
    %57 = vector.extract_strided_slice %9 {offsets = [0, 16], sizes = [8, 8], strides = [1, 1]} : vector<8x32xf32> to vector<8x8xf32>
    %c16 = arith.constant 16 : index
    %c0_35 = arith.constant 0 : index
    %58 = vector.load %arg15[%c16, %c0_35] : memref<32x8xf32, #tpu.memory_space<vmem>>, vector<8x8xf32>
    %cst_36 = arith.constant dense<0.000000e+00> : vector<8x8xf32>
    %59 = tpu.matmul %57, %58, %cst_36 {dimension_numbers = #tpu.dot_dimension_numbers<[1], [0], [0], [1], [0, 0, 1, 1], [], []>} : vector<8x8xf32>, vector<8x8xf32>, vector<8x8xf32> -> vector<8x8xf32>
    %cst_37 = arith.constant 0.353553385 : f32
    %60 = vector.broadcast %cst_37 : f32 to vector<8x8xf32>
    %61 = arith.mulf %59, %60 : vector<8x8xf32>
    %cst_38 = arith.constant -1.000000e+09 : f32
    %62 = vector.broadcast %cst_38 : f32 to vector<8x8xf32>
    %63 = arith.select %13, %62, %61 : vector<8x8xi1>, vector<8x8xf32>
    %cst_39 = arith.constant dense<0xFF800000> : vector<8xf32>
    %64 = vector.multi_reduction <maximumf>, %63, %cst_39 [1] : vector<8x8xf32> to vector<8xf32>
    %65 = vector.shape_cast %64 : vector<8xf32> to vector<8x1xf32>
    %66 = vector.broadcast %65 : vector<8x1xf32> to vector<8x8xf32>
    %67 = arith.subf %63, %66 : vector<8x8xf32>
    %68 = math.exp %67 : vector<8x8xf32>
    %cst_40 = arith.constant dense<0.000000e+00> : vector<8xf32>
    %69 = vector.multi_reduction <add>, %68, %cst_40 [1] : vector<8x8xf32> to vector<8xf32>
    %70 = vector.shape_cast %69 : vector<8xf32> to vector<8x1xf32>
    %71 = tpu.reciprocal %70 {approx = true} : vector<8x1xf32> -> vector<8x1xf32>
    %72 = vector.broadcast %71 : vector<8x1xf32> to vector<8x8xf32>
    %73 = arith.mulf %68, %72 : vector<8x8xf32>
    %c0_41 = arith.constant 0 : index
    %c16_42 = arith.constant 16 : index
    %74 = vector.load %arg16[%c0_41, %c16_42] : memref<8x32xf32, #tpu.memory_space<vmem>>, vector<8x8xf32>
    %cst_43 = arith.constant dense<0.000000e+00> : vector<8x8xf32>
    %75 = tpu.matmul %73, %74, %cst_43 {dimension_numbers = #tpu.dot_dimension_numbers<[1], [0], [0], [1], [0, 0, 1, 1], [], []>} : vector<8x8xf32>, vector<8x8xf32>, vector<8x8xf32> -> vector<8x8xf32>
    %c16_44 = arith.constant 16 : index
    %c0_45 = arith.constant 0 : index
    %76 = vector.load %arg12[%c16_44, %c0_45] : memref<32x32xf32, #tpu.memory_space<vmem>>, vector<8x32xf32>
    %cst_46 = arith.constant dense<0.000000e+00> : vector<8x32xf32>
    %77 = tpu.matmul %75, %76, %cst_46 {dimension_numbers = #tpu.dot_dimension_numbers<[1], [0], [0], [1], [0, 0, 1, 1], [], []>} : vector<8x8xf32>, vector<8x32xf32>, vector<8x32xf32> -> vector<8x32xf32>
    %78 = arith.addf %56, %77 : vector<8x32xf32>
    %79 = vector.extract_strided_slice %9 {offsets = [0, 24], sizes = [8, 8], strides = [1, 1]} : vector<8x32xf32> to vector<8x8xf32>
    %c24 = arith.constant 24 : index
    %c0_47 = arith.constant 0 : index
    %80 = vector.load %arg15[%c24, %c0_47] : memref<32x8xf32, #tpu.memory_space<vmem>>, vector<8x8xf32>
    %cst_48 = arith.constant dense<0.000000e+00> : vector<8x8xf32>
    %81 = tpu.matmul %79, %80, %cst_48 {dimension_numbers = #tpu.dot_dimension_numbers<[1], [0], [0], [1], [0, 0, 1, 1], [], []>} : vector<8x8xf32>, vector<8x8xf32>, vector<8x8xf32> -> vector<8x8xf32>
    %cst_49 = arith.constant 0.353553385 : f32
    %82 = vector.broadcast %cst_49 : f32 to vector<8x8xf32>
    %83 = arith.mulf %81, %82 : vector<8x8xf32>
    %cst_50 = arith.constant -1.000000e+09 : f32
    %84 = vector.broadcast %cst_50 : f32 to vector<8x8xf32>
    %85 = arith.select %13, %84, %83 : vector<8x8xi1>, vector<8x8xf32>
    %cst_51 = arith.constant dense<0xFF800000> : vector<8xf32>
    %86 = vector.multi_reduction <maximumf>, %85, %cst_51 [1] : vector<8x8xf32> to vector<8xf32>
    %87 = vector.shape_cast %86 : vector<8xf32> to vector<8x1xf32>
    %88 = vector.broadcast %87 : vector<8x1xf32> to vector<8x8xf32>
    %89 = arith.subf %85, %88 : vector<8x8xf32>
    %90 = math.exp %89 : vector<8x8xf32>
    %cst_52 = arith.constant dense<0.000000e+00> : vector<8xf32>
    %91 = vector.multi_reduction <add>, %90, %cst_52 [1] : vector<8x8xf32> to vector<8xf32>
    %92 = vector.shape_cast %91 : vector<8xf32> to vector<8x1xf32>
    %93 = tpu.reciprocal %92 {approx = true} : vector<8x1xf32> -> vector<8x1xf32>
    %94 = vector.broadcast %93 : vector<8x1xf32> to vector<8x8xf32>
    %95 = arith.mulf %90, %94 : vector<8x8xf32>
    %c0_53 = arith.constant 0 : index
    %c24_54 = arith.constant 24 : index
    %96 = vector.load %arg16[%c0_53, %c24_54] : memref<8x32xf32, #tpu.memory_space<vmem>>, vector<8x8xf32>
    %cst_55 = arith.constant dense<0.000000e+00> : vector<8x8xf32>
    %97 = tpu.matmul %95, %96, %cst_55 {dimension_numbers = #tpu.dot_dimension_numbers<[1], [0], [0], [1], [0, 0, 1, 1], [], []>} : vector<8x8xf32>, vector<8x8xf32>, vector<8x8xf32> -> vector<8x8xf32>
    %c24_56 = arith.constant 24 : index
    %c0_57 = arith.constant 0 : index
    %98 = vector.load %arg12[%c24_56, %c0_57] : memref<32x32xf32, #tpu.memory_space<vmem>>, vector<8x32xf32>
    %cst_58 = arith.constant dense<0.000000e+00> : vector<8x32xf32>
    %99 = tpu.matmul %97, %98, %cst_58 {dimension_numbers = #tpu.dot_dimension_numbers<[1], [0], [0], [1], [0, 0, 1, 1], [], []>} : vector<8x8xf32>, vector<8x32xf32>, vector<8x32xf32> -> vector<8x32xf32>
    %100 = arith.addf %78, %99 : vector<8x32xf32>
    %c0_59 = arith.constant 0 : index
    %c0_60 = arith.constant 0 : index
    %101 = vector.load %arg13[%c0_59, %c0_60] : memref<1x32xf32, #tpu.memory_space<vmem>>, vector<1x32xf32>
    %102 = vector.broadcast %101 : vector<1x32xf32> to vector<8x32xf32>
    %103 = arith.addf %100, %102 : vector<8x32xf32>
    %c0_61 = arith.constant 0 : index
    %c0_62 = arith.constant 0 : index
    %c0_63 = arith.constant 0 : index
    %104 = vector.load %arg14[%c0_61, %c0_62, %c0_63] : memref<1x8x32xf32, #tpu.memory_space<vmem>>, vector<1x8x32xf32>
    %105 = vector.shape_cast %104 : vector<1x8x32xf32> to vector<8x32xf32>
    %106 = vector.shape_cast %103 : vector<8x32xf32> to vector<1x8x32xf32>
    tpu.vector_store %arg14[%c0_61, %c0_62, %c0_63], %106 {strides = array<i32>} : memref<1x8x32xf32, #tpu.memory_space<vmem>>, vector<1x8x32xf32>,
    return
  }
  func.func @transform_0(%arg0: i32, %arg1: i32) -> (i32, i32, i32) {
    %c0_i32 = arith.constant 0 : i32
    %c0_i32_0 = arith.constant 0 : i32
    return %arg0, %arg1, %c0_i32 : i32, i32, i32
  }
  func.func @transform_1(%arg0: i32, %arg1: i32) -> (i32, i32, i32) {
    %c0_i32 = arith.constant 0 : i32
    %c0_i32_0 = arith.constant 0 : i32
    %c0_i32_1 = arith.constant 0 : i32
    return %arg0, %c0_i32, %c0_i32_0 : i32, i32, i32
  }
  func.func @transform_2(%arg0: i32, %arg1: i32) -> (i32, i32, i32) {
    %c0_i32 = arith.constant 0 : i32
    %c0_i32_0 = arith.constant 0 : i32
    %c0_i32_1 = arith.constant 0 : i32
    return %arg0, %c0_i32, %c0_i32_0 : i32, i32, i32
  }
  func.func @transform_3(%arg0: i32, %arg1: i32) -> (i32, i32, i32) {
    %c0_i32 = arith.constant 0 : i32
    %c0_i32_0 = arith.constant 0 : i32
    return %arg0, %arg1, %c0_i32 : i32, i32, i32
  }
  func.func @transform_4(%arg0: i32, %arg1: i32) -> (i32, i32) {
    %c0_i32 = arith.constant 0 : i32
    %c0_i32_0 = arith.constant 0 : i32
    %c0_i32_1 = arith.constant 0 : i32
    return %c0_i32, %c0_i32_0 : i32, i32
  }
  func.func @transform_5(%arg0: i32, %arg1: i32) -> (i32, i32) {
    %c0_i32 = arith.constant 0 : i32
    %c0_i32_0 = arith.constant 0 : i32
    %c0_i32_1 = arith.constant 0 : i32
    return %c0_i32, %c0_i32_0 : i32, i32
  }
  func.func @transform_6(%arg0: i32, %arg1: i32) -> (i32, i32) {
    %c0_i32 = arith.constant 0 : i32
    %c0_i32_0 = arith.constant 0 : i32
    %c0_i32_1 = arith.constant 0 : i32
    return %c0_i32, %c0_i32_0 : i32, i32
  }
  func.func @transform_7(%arg0: i32, %arg1: i32) -> (i32, i32) {
    %c0_i32 = arith.constant 0 : i32
    %c0_i32_0 = arith.constant 0 : i32
    %c0_i32_1 = arith.constant 0 : i32
    return %c0_i32, %c0_i32_0 : i32, i32
  }
  func.func @transform_8(%arg0: i32, %arg1: i32) -> (i32, i32) {
    %c0_i32 = arith.constant 0 : i32
    %c0_i32_0 = arith.constant 0 : i32
    %c0_i32_1 = arith.constant 0 : i32
    return %c0_i32, %c0_i32_0 : i32, i32
  }
  func.func @transform_9(%arg0: i32, %arg1: i32) -> (i32, i32) {
    %c0_i32 = arith.constant 0 : i32
    %c0_i32_0 = arith.constant 0 : i32
    %c0_i32_1 = arith.constant 0 : i32
    return %c0_i32, %c0_i32_0 : i32, i32
  }
  func.func @transform_10(%arg0: i32, %arg1: i32) -> (i32, i32) {
    %c0_i32 = arith.constant 0 : i32
    %c0_i32_0 = arith.constant 0 : i32
    %c0_i32_1 = arith.constant 0 : i32
    return %c0_i32, %c0_i32_0 : i32, i32
  }
  func.func @transform_11(%arg0: i32, %arg1: i32) -> (i32, i32) {
    %c0_i32 = arith.constant 0 : i32
    %c0_i32_0 = arith.constant 0 : i32
    %c0_i32_1 = arith.constant 0 : i32
    return %c0_i32, %c0_i32_0 : i32, i32
  }
  func.func @transform_12(%arg0: i32, %arg1: i32) -> (i32, i32, i32) {
    %c0_i32 = arith.constant 0 : i32
    %c0_i32_0 = arith.constant 0 : i32
    return %arg0, %arg1, %c0_i32 : i32, i32, i32
  }
}

module attributes {stable_mosaic.version = 11 : i64} {
  func.func @kernel(%arg0: i32, %arg1: i32, %arg2: memref<1x8x32xf32, #tpu.memory_space<vmem>>, %arg3: memref<1x8x32xf32, #tpu.memory_space<vmem>>, %arg4: memref<1x8x32xf32, #tpu.memory_space<vmem>>, %arg5: memref<1x8x8xi8, #tpu.memory_space<vmem>>, %arg6: memref<32x32xf32, #tpu.memory_space<vmem>>, %arg7: memref<1x32xf32, #tpu.memory_space<vmem>>, %arg8: memref<32x32xf32, #tpu.memory_space<vmem>>, %arg9: memref<1x32xf32, #tpu.memory_space<vmem>>, %arg10: memref<32x32xf32, #tpu.memory_space<vmem>>, %arg11: memref<1x32xf32, #tpu.memory_space<vmem>>, %arg12: memref<32x32xf32, #tpu.memory_space<vmem>>, %arg13: memref<1x32xf32, #tpu.memory_space<vmem>>, %arg14: memref<1x8x32xf32, #tpu.memory_space<vmem>>, %arg15: memref<32x8xf32, #tpu.memory_space<vmem>>, %arg16: memref<8x32xf32, #tpu.memory_space<vmem>>) attributes {dimension_semantics = [#tpu.dimension_semantics<parallel>, #tpu.dimension_semantics<arbitrary>], iteration_bounds = array<i64: 2, 1>, scalar_prefetch = 0 : i64, scratch_operands = 2 : i64, tpu.core_type = #tpu.core_type<tc>, window_params = [{transform_indices = @transform_0, window_bounds = array<i64: 1, 8, 32>}, {transform_indices = @transform_1, window_bounds = array<i64: 1, 8, 32>}, {transform_indices = @transform_2, window_bounds = array<i64: 1, 8, 32>}, {transform_indices = @transform_3, window_bounds = array<i64: 1, 8, 8>}, {pipeline_mode = #tpu.pipeline_mode<synchronous>, transform_indices = @transform_4, window_bounds = array<i64: 32, 32>}, {pipeline_mode = #tpu.pipeline_mode<synchronous>, transform_indices = @transform_5, window_bounds = array<i64: 1, 32>}, {pipeline_mode = #tpu.pipeline_mode<synchronous>, transform_indices = @transform_6, window_bounds = array<i64: 32, 32>}, {pipeline_mode = #tpu.pipeline_mode<synchronous>, transform_indices = @transform_7, window_bounds = array<i64: 1, 32>}, {pipeline_mode = #tpu.pipeline_mode<synchronous>, transform_indices = @transform_8, window_bounds = array<i64: 32, 32>}, {pipeline_mode = #tpu.pipeline_mode<synchronous>, transform_indices = @transform_9, window_bounds = array<i64: 1, 32>}, {pipeline_mode = #tpu.pipeline_mode<synchronous>, transform_indices = @transform_10, window_bounds = array<i64: 32, 32>}, {pipeline_mode = #tpu.pipeline_mode<synchronous>, transform_indices = @transform_11, window_bounds = array<i64: 1, 32>}, {transform_indices = @transform_12, window_bounds = array<i64: 1, 8, 32>}]} {
    %c0_i32 = arith.constant 0 : i32
    %0 = arith.cmpi eq, %arg1, %c0_i32 : i32
    %1 = arith.extui %0 : i1 to i32
    %c0_i32_0 = arith.constant 0 : i32
    %2 = arith.cmpi ne, %1, %c0_i32_0 : i32
    scf.if %2 {
      %c0_64 = arith.constant 0 : index
      %c0_65 = arith.constant 0 : index
      %c0_66 = arith.constant 0 : index
      %107 = vector.load %arg3[%c0_64, %c0_65, %c0_66] : memref<1x8x32xf32, #tpu.memory_space<vmem>>, vector<1x8x32xf32>
      %108 = vector.shape_cast %107 : vector<1x8x32xf32> to vector<8x32xf32>
      %c0_67 = arith.constant 0 : index
      %c0_68 = arith.constant 0 : index
      %109 = vector.load %arg8[%c0_67, %c0_68] : memref<32x32xf32, #tpu.memory_space<vmem>>, vector<32x32xf32>
      %cst_69 = arith.constant dense<0.000000e+00> : vector<8x32xf32>
      %110 = tpu.matmul %108, %109, %cst_69 {dimension_numbers = #tpu.dot_dimension_numbers<[1], [0], [0], [1], [0, 0, 1, 1], [], []>} : vector<8x32xf32>, vector<32x32xf32>, vector<8x32xf32> -> vector<8x32xf32>
      %c0_70 = arith.constant 0 : index
      %c0_71 = arith.constant 0 : index
      %111 = vector.load %arg9[%c0_70, %c0_71] : memref<1x32xf32, #tpu.memory_space<vmem>>, vector<1x32xf32>
      %112 = vector.broadcast %111 : vector<1x32xf32> to vector<8x32xf32>
      %113 = arith.addf %110, %112 : vector<8x32xf32>
      %c0_72 = arith.constant 0 : index
      %c0_73 = arith.constant 0 : index
      %c0_74 = arith.constant 0 : index
      %114 = vector.load %arg4[%c0_72, %c0_73, %c0_74] : memref<1x8x32xf32, #tpu.memory_space<vmem>>, vector<1x8x32xf32>
      %115 = vector.shape_cast %114 : vector<1x8x32xf32> to vector<8x32xf32>
      %c0_75 = arith.constant 0 : index
      %c0_76 = arith.constant 0 : index
      %116 = vector.load %arg10[%c0_75, %c0_76] : memref<32x32xf32, #tpu.memory_space<vmem>>, vector<32x32xf32>
      %cst_77 = arith.constant dense<0.000000e+00> : vector<8x32xf32>
      %117 = tpu.matmul %115, %116, %cst_77 {dimension_numbers = #tpu.dot_dimension_numbers<[1], [0], [0], [1], [0, 0, 1, 1], [], []>} : vector<8x32xf32>, vector<32x32xf32>, vector<8x32xf32> -> vector<8x32xf32>
      %c0_78 = arith.constant 0 : index
      %c0_79 = arith.constant 0 : index
      %118 = vector.load %arg11[%c0_78, %c0_79] : memref<1x32xf32, #tpu.memory_space<vmem>>, vector<1x32xf32>
      %119 = vector.broadcast %118 : vector<1x32xf32> to vector<8x32xf32>
      %120 = arith.addf %117, %119 : vector<8x32xf32>
      %121 = tpu.transpose %113, [1, 0] : vector<8x32xf32> -> vector<32x8xf32>
      %c0_80 = arith.constant 0 : index
      %c0_81 = arith.constant 0 : index
      %122 = vector.load %arg15[%c0_80, %c0_81] : memref<32x8xf32, #tpu.memory_space<vmem>>, vector<32x8xf32>
      tpu.vector_store %arg15[%c0_80, %c0_81], %121 {strides = array<i32>} : memref<32x8xf32, #tpu.memory_space<vmem>>, vector<32x8xf32>,
      %c0_82 = arith.constant 0 : index
      %c0_83 = arith.constant 0 : index
      %123 = vector.load %arg16[%c0_82, %c0_83] : memref<8x32xf32, #tpu.memory_space<vmem>>, vector<8x32xf32>
      tpu.vector_store %arg16[%c0_82, %c0_83], %120 {strides = array<i32>} : memref<8x32xf32, #tpu.memory_space<vmem>>, vector<8x32xf32>,
    } else {
    }
    %c0 = arith.constant 0 : index
    %c0_1 = arith.constant 0 : index
    %c0_2 = arith.constant 0 : index
    %3 = vector.load %arg2[%c0, %c0_1, %c0_2] : memref<1x8x32xf32, #tpu.memory_space<vmem>>, vector<1x8x32xf32>
    %4 = vector.shape_cast %3 : vector<1x8x32xf32> to vector<8x32xf32>
    %c0_3 = arith.constant 0 : index
    %c0_4 = arith.constant 0 : index
    %5 = vector.load %arg6[%c0_3, %c0_4] : memref<32x32xf32, #tpu.memory_space<vmem>>, vector<32x32xf32>
    %cst = arith.constant dense<0.000000e+00> : vector<8x32xf32>
    %6 = tpu.matmul %4, %5, %cst {dimension_numbers = #tpu.dot_dimension_numbers<[1], [0], [0], [1], [0, 0, 1, 1], [], []>} : vector<8x32xf32>, vector<32x32xf32>, vector<8x32xf32> -> vector<8x32xf32>
    %c0_5 = arith.constant 0 : index
    %c0_6 = arith.constant 0 : index
    %7 = vector.load %arg7[%c0_5, %c0_6] : memref<1x32xf32, #tpu.memory_space<vmem>>, vector<1x32xf32>
    %8 = vector.broadcast %7 : vector<1x32xf32> to vector<8x32xf32>
    %9 = arith.addf %6, %8 : vector<8x32xf32>
    %c0_7 = arith.constant 0 : index
    %c0_8 = arith.constant 0 : index
    %c0_9 = arith.constant 0 : index
    %10 = vector.load %arg5[%c0_7, %c0_8, %c0_9] : memref<1x8x8xi8, #tpu.memory_space<vmem>>, vector<1x8x8xi8>
    %11 = vector.shape_cast %10 : vector<1x8x8xi8> to vector<8x8xi8>
    %c0_i8 = arith.constant 0 : i8
    %12 = vector.broadcast %c0_i8 : i8 to vector<8x8xi8>
    %13 = arith.cmpi ne, %11, %12 : vector<8x8xi8>
    %14 = vector.extract_strided_slice %9 {offsets = [0, 0], sizes = [8, 8], strides = [1, 1]} : vector<8x32xf32> to vector<8x8xf32>
    %c0_10 = arith.constant 0 : index
    %c0_11 = arith.constant 0 : index
    %15 = vector.load %arg15[%c0_10, %c0_11] : memref<32x8xf32, #tpu.memory_space<vmem>>, vector<8x8xf32>
    %cst_12 = arith.constant dense<0.000000e+00> : vector<8x8xf32>
    %16 = tpu.matmul %14, %15, %cst_12 {dimension_numbers = #tpu.dot_dimension_numbers<[1], [0], [0], [1], [0, 0, 1, 1], [], []>} : vector<8x8xf32>, vector<8x8xf32>, vector<8x8xf32> -> vector<8x8xf32>
    %cst_13 = arith.constant 0.353553385 : f32
    %17 = vector.broadcast %cst_13 : f32 to vector<8x8xf32>
    %18 = arith.mulf %16, %17 : vector<8x8xf32>
    %cst_14 = arith.constant -1.000000e+09 : f32
    %19 = vector.broadcast %cst_14 : f32 to vector<8x8xf32>
    %20 = arith.select %13, %19, %18 : vector<8x8xi1>, vector<8x8xf32>
    %cst_15 = arith.constant dense<0xFF800000> : vector<8xf32>
    %21 = vector.multi_reduction <maximumf>, %20, %cst_15 [1] : vector<8x8xf32> to vector<8xf32>
    %22 = vector.shape_cast %21 : vector<8xf32> to vector<8x1xf32>
    %23 = vector.broadcast %22 : vector<8x1xf32> to vector<8x8xf32>
    %24 = arith.subf %20, %23 : vector<8x8xf32>
    %25 = math.exp %24 : vector<8x8xf32>
    %cst_16 = arith.constant dense<0.000000e+00> : vector<8xf32>
    %26 = vector.multi_reduction <add>, %25, %cst_16 [1] : vector<8x8xf32> to vector<8xf32>
    %27 = vector.shape_cast %26 : vector<8xf32> to vector<8x1xf32>
    %28 = tpu.reciprocal %27 {approx = true} : vector<8x1xf32> -> vector<8x1xf32>
    %29 = vector.broadcast %28 : vector<8x1xf32> to vector<8x8xf32>
    %30 = arith.mulf %25, %29 : vector<8x8xf32>
    %c0_17 = arith.constant 0 : index
    %c0_18 = arith.constant 0 : index
    %31 = vector.load %arg16[%c0_17, %c0_18] : memref<8x32xf32, #tpu.memory_space<vmem>>, vector<8x8xf32>
    %cst_19 = arith.constant dense<0.000000e+00> : vector<8x8xf32>
    %32 = tpu.matmul %30, %31, %cst_19 {dimension_numbers = #tpu.dot_dimension_numbers<[1], [0], [0], [1], [0, 0, 1, 1], [], []>} : vector<8x8xf32>, vector<8x8xf32>, vector<8x8xf32> -> vector<8x8xf32>
    %c0_20 = arith.constant 0 : index
    %c0_21 = arith.constant 0 : index
    %33 = vector.load %arg12[%c0_20, %c0_21] : memref<32x32xf32, #tpu.memory_space<vmem>>, vector<8x32xf32>
    %cst_22 = arith.constant dense<0.000000e+00> : vector<8x32xf32>
    %34 = tpu.matmul %32, %33, %cst_22 {dimension_numbers = #tpu.dot_dimension_numbers<[1], [0], [0], [1], [0, 0, 1, 1], [], []>} : vector<8x8xf32>, vector<8x32xf32>, vector<8x32xf32> -> vector<8x32xf32>
    %35 = vector.extract_strided_slice %9 {offsets = [0, 8], sizes = [8, 8], strides = [1, 1]} : vector<8x32xf32> to vector<8x8xf32>
    %c8 = arith.constant 8 : index
    %c0_23 = arith.constant 0 : index
    %36 = vector.load %arg15[%c8, %c0_23] : memref<32x8xf32, #tpu.memory_space<vmem>>, vector<8x8xf32>
    %cst_24 = arith.constant dense<0.000000e+00> : vector<8x8xf32>
    %37 = tpu.matmul %35, %36, %cst_24 {dimension_numbers = #tpu.dot_dimension_numbers<[1], [0], [0], [1], [0, 0, 1, 1], [], []>} : vector<8x8xf32>, vector<8x8xf32>, vector<8x8xf32> -> vector<8x8xf32>
    %cst_25 = arith.constant 0.353553385 : f32
    %38 = vector.broadcast %cst_25 : f32 to vector<8x8xf32>
    %39 = arith.mulf %37, %38 : vector<8x8xf32>
    %cst_26 = arith.constant -1.000000e+09 : f32
    %40 = vector.broadcast %cst_26 : f32 to vector<8x8xf32>
    %41 = arith.select %13, %40, %39 : vector<8x8xi1>, vector<8x8xf32>
    %cst_27 = arith.constant dense<0xFF800000> : vector<8xf32>
    %42 = vector.multi_reduction <maximumf>, %41, %cst_27 [1] : vector<8x8xf32> to vector<8xf32>
    %43 = vector.shape_cast %42 : vector<8xf32> to vector<8x1xf32>
    %44 = vector.broadcast %43 : vector<8x1xf32> to vector<8x8xf32>
    %45 = arith.subf %41, %44 : vector<8x8xf32>
    %46 = math.exp %45 : vector<8x8xf32>
    %cst_28 = arith.constant dense<0.000000e+00> : vector<8xf32>
    %47 = vector.multi_reduction <add>, %46, %cst_28 [1] : vector<8x8xf32> to vector<8xf32>
    %48 = vector.shape_cast %47 : vector<8xf32> to vector<8x1xf32>
    %49 = tpu.reciprocal %48 {approx = true} : vector<8x1xf32> -> vector<8x1xf32>
    %50 = vector.broadcast %49 : vector<8x1xf32> to vector<8x8xf32>
    %51 = arith.mulf %46, %50 : vector<8x8xf32>
    %c0_29 = arith.constant 0 : index
    %c8_30 = arith.constant 8 : index
    %52 = vector.load %arg16[%c0_29, %c8_30] : memref<8x32xf32, #tpu.memory_space<vmem>>, vector<8x8xf32>
    %cst_31 = arith.constant dense<0.000000e+00> : vector<8x8xf32>
    %53 = tpu.matmul %51, %52, %cst_31 {dimension_numbers = #tpu.dot_dimension_numbers<[1], [0], [0], [1], [0, 0, 1, 1], [], []>} : vector<8x8xf32>, vector<8x8xf32>, vector<8x8xf32> -> vector<8x8xf32>
    %c8_32 = arith.constant 8 : index
    %c0_33 = arith.constant 0 : index
    %54 = vector.load %arg12[%c8_32, %c0_33] : memref<32x32xf32, #tpu.memory_space<vmem>>, vector<8x32xf32>
    %cst_34 = arith.constant dense<0.000000e+00> : vector<8x32xf32>
    %55 = tpu.matmul %53, %54, %cst_34 {dimension_numbers = #tpu.dot_dimension_numbers<[1], [0], [0], [1], [0, 0, 1, 1], [], []>} : vector<8x8xf32>, vector<8x32xf32>, vector<8x32xf32> -> vector<8x32xf32>
    %56 = arith.addf %34, %55 : vector<8x32xf32>
    %57 = vector.extract_strided_slice %9 {offsets = [0, 16], sizes = [8, 8], strides = [1, 1]} : vector<8x32xf32> to vector<8x8xf32>
    %c16 = arith.constant 16 : index
    %c0_35 = arith.constant 0 : index
    %58 = vector.load %arg15[%c16, %c0_35] : memref<32x8xf32, #tpu.memory_space<vmem>>, vector<8x8xf32>
    %cst_36 = arith.constant dense<0.000000e+00> : vector<8x8xf32>
    %59 = tpu.matmul %57, %58, %cst_36 {dimension_numbers = #tpu.dot_dimension_numbers<[1], [0], [0], [1], [0, 0, 1, 1], [], []>} : vector<8x8xf32>, vector<8x8xf32>, vector<8x8xf32> -> vector<8x8xf32>
    %cst_37 = arith.constant 0.353553385 : f32
    %60 = vector.broadcast %cst_37 : f32 to vector<8x8xf32>
    %61 = arith.mulf %59, %60 : vector<8x8xf32>
    %cst_38 = arith.constant -1.000000e+09 : f32
    %62 = vector.broadcast %cst_38 : f32 to vector<8x8xf32>
    %63 = arith.select %13, %62, %61 : vector<8x8xi1>, vector<8x8xf32>
    %cst_39 = arith.constant dense<0xFF800000> : vector<8xf32>
    %64 = vector.multi_reduction <maximumf>, %63, %cst_39 [1] : vector<8x8xf32> to vector<8xf32>
    %65 = vector.shape_cast %64 : vector<8xf32> to vector<8x1xf32>
    %66 = vector.broadcast %65 : vector<8x1xf32> to vector<8x8xf32>
    %67 = arith.subf %63, %66 : vector<8x8xf32>
    %68 = math.exp %67 : vector<8x8xf32>
    %cst_40 = arith.constant dense<0.000000e+00> : vector<8xf32>
    %69 = vector.multi_reduction <add>, %68, %cst_40 [1] : vector<8x8xf32> to vector<8xf32>
    %70 = vector.shape_cast %69 : vector<8xf32> to vector<8x1xf32>
    %71 = tpu.reciprocal %70 {approx = true} : vector<8x1xf32> -> vector<8x1xf32>
    %72 = vector.broadcast %71 : vector<8x1xf32> to vector<8x8xf32>
    %73 = arith.mulf %68, %72 : vector<8x8xf32>
    %c0_41 = arith.constant 0 : index
    %c16_42 = arith.constant 16 : index
    %74 = vector.load %arg16[%c0_41, %c16_42] : memref<8x32xf32, #tpu.memory_space<vmem>>, vector<8x8xf32>
    %cst_43 = arith.constant dense<0.000000e+00> : vector<8x8xf32>
    %75 = tpu.matmul %73, %74, %cst_43 {dimension_numbers = #tpu.dot_dimension_numbers<[1], [0], [0], [1], [0, 0, 1, 1], [], []>} : vector<8x8xf32>, vector<8x8xf32>, vector<8x8xf32> -> vector<8x8xf32>
    %c16_44 = arith.constant 16 : index
    %c0_45 = arith.constant 0 : index
    %76 = vector.load %arg12[%c16_44, %c0_45] : memref<32x32xf32, #tpu.memory_space<vmem>>, vector<8x32xf32>
    %cst_46 = arith.constant dense<0.000000e+00> : vector<8x32xf32>
    %77 = tpu.matmul %75, %76, %cst_46 {dimension_numbers = #tpu.dot_dimension_numbers<[1], [0], [0], [1], [0, 0, 1, 1], [], []>} : vector<8x8xf32>, vector<8x32xf32>, vector<8x32xf32> -> vector<8x32xf32>
    %78 = arith.addf %56, %77 : vector<8x32xf32>
    %79 = vector.extract_strided_slice %9 {offsets = [0, 24], sizes = [8, 8], strides = [1, 1]} : vector<8x32xf32> to vector<8x8xf32>
    %c24 = arith.constant 24 : index
    %c0_47 = arith.constant 0 : index
    %80 = vector.load %arg15[%c24, %c0_47] : memref<32x8xf32, #tpu.memory_space<vmem>>, vector<8x8xf32>
    %cst_48 = arith.constant dense<0.000000e+00> : vector<8x8xf32>
    %81 = tpu.matmul %79, %80, %cst_48 {dimension_numbers = #tpu.dot_dimension_numbers<[1], [0], [0], [1], [0, 0, 1, 1], [], []>} : vector<8x8xf32>, vector<8x8xf32>, vector<8x8xf32> -> vector<8x8xf32>
    %cst_49 = arith.constant 0.353553385 : f32
    %82 = vector.broadcast %cst_49 : f32 to vector<8x8xf32>
    %83 = arith.mulf %81, %82 : vector<8x8xf32>
    %cst_50 = arith.constant -1.000000e+09 : f32
    %84 = vector.broadcast %cst_50 : f32 to vector<8x8xf32>
    %85 = arith.select %13, %84, %83 : vector<8x8xi1>, vector<8x8xf32>
    %cst_51 = arith.constant dense<0xFF800000> : vector<8xf32>
    %86 = vector.multi_reduction <maximumf>, %85, %cst_51 [1] : vector<8x8xf32> to vector<8xf32>
    %87 = vector.shape_cast %86 : vector<8xf32> to vector<8x1xf32>
    %88 = vector.broadcast %87 : vector<8x1xf32> to vector<8x8xf32>
    %89 = arith.subf %85, %88 : vector<8x8xf32>
    %90 = math.exp %89 : vector<8x8xf32>
    %cst_52 = arith.constant dense<0.000000e+00> : vector<8xf32>
    %91 = vector.multi_reduction <add>, %90, %cst_52 [1] : vector<8x8xf32> to vector<8xf32>
    %92 = vector.shape_cast %91 : vector<8xf32> to vector<8x1xf32>
    %93 = tpu.reciprocal %92 {approx = true} : vector<8x1xf32> -> vector<8x1xf32>
    %94 = vector.broadcast %93 : vector<8x1xf32> to vector<8x8xf32>
    %95 = arith.mulf %90, %94 : vector<8x8xf32>
    %c0_53 = arith.constant 0 : index
    %c24_54 = arith.constant 24 : index
    %96 = vector.load %arg16[%c0_53, %c24_54] : memref<8x32xf32, #tpu.memory_space<vmem>>, vector<8x8xf32>
    %cst_55 = arith.constant dense<0.000000e+00> : vector<8x8xf32>
    %97 = tpu.matmul %95, %96, %cst_55 {dimension_numbers = #tpu.dot_dimension_numbers<[1], [0], [0], [1], [0, 0, 1, 1], [], []>} : vector<8x8xf32>, vector<8x8xf32>, vector<8x8xf32> -> vector<8x8xf32>
    %c24_56 = arith.constant 24 : index
    %c0_57 = arith.constant 0 : index
    %98 = vector.load %arg12[%c24_56, %c0_57] : memref<32x32xf32, #tpu.memory_space<vmem>>, vector<8x32xf32>
    %cst_58 = arith.constant dense<0.000000e+00> : vector<8x32xf32>
    %99 = tpu.matmul %97, %98, %cst_58 {dimension_numbers = #tpu.dot_dimension_numbers<[1], [0], [0], [1], [0, 0, 1, 1], [], []>} : vector<8x8xf32>, vector<8x32xf32>, vector<8x32xf32> -> vector<8x32xf32>
    %100 = arith.addf %78, %99 : vector<8x32xf32>
    %c0_59 = arith.constant 0 : index
    %c0_60 = arith.constant 0 : index
    %101 = vector.load %arg13[%c0_59, %c0_60] : memref<1x32xf32, #tpu.memory_space<vmem>>, vector<1x32xf32>
    %102 = vector.broadcast %101 : vector<1x32xf32> to vector<8x32xf32>
    %103 = arith.addf %100, %102 : vector<8x32xf32>
    %c0_61 = arith.constant 0 : index
    %c0_62 = arith.constant 0 : index
    %c0_63 = arith.constant 0 : index
    %104 = vector.load %arg14[%c0_61, %c0_62, %c0_63] : memref<1x8x32xf32, #tpu.memory_space<vmem>>, vector<1x8x32xf32>
    %105 = vector.shape_cast %104 : vector<1x8x32xf32> to vector<8x32xf32>
    %106 = vector.shape_cast %103 : vector<8x32xf32> to vector<1x8x32xf32>
    tpu.vector_store %arg14[%c0_61, %c0_62, %c0_63], %106 {strides = array<i32>} : memref<1x8x32xf32, #tpu.memory_space<vmem>>, vector<1x8x32xf32>,
    return
  }
  func.func @transform_0(%arg0: i32, %arg1: i32) -> (i32, i32, i32) {
    %c0_i32 = arith.constant 0 : i32
    %c0_i32_0 = arith.constant 0 : i32
    return %arg0, %arg1, %c0_i32 : i32, i32, i32
  }
  func.func @transform_1(%arg0: i32, %arg1: i32) -> (i32, i32, i32) {
    %c0_i32 = arith.constant 0 : i32
    %c0_i32_0 = arith.constant 0 : i32
    %c0_i32_1 = arith.constant 0 : i32
    return %arg0, %c0_i32, %c0_i32_0 : i32, i32, i32
  }
  func.func @transform_2(%arg0: i32, %arg1: i32) -> (i32, i32, i32) {
    %c0_i32 = arith.constant 0 : i32
    %c0_i32_0 = arith.constant 0 : i32
    %c0_i32_1 = arith.constant 0 : i32
    return %arg0, %c0_i32, %c0_i32_0 : i32, i32, i32
  }
  func.func @transform_3(%arg0: i32, %arg1: i32) -> (i32, i32, i32) {
    %c0_i32 = arith.constant 0 : i32
    %c0_i32_0 = arith.constant 0 : i32
    return %arg0, %arg1, %c0_i32 : i32, i32, i32
  }
  func.func @transform_4(%arg0: i32, %arg1: i32) -> (i32, i32) {
    %c0_i32 = arith.constant 0 : i32
    %c0_i32_0 = arith.constant 0 : i32
    %c0_i32_1 = arith.constant 0 : i32
    return %c0_i32, %c0_i32_0 : i32, i32
  }
  func.func @transform_5(%arg0: i32, %arg1: i32) -> (i32, i32) {
    %c0_i32 = arith.constant 0 : i32
    %c0_i32_0 = arith.constant 0 : i32
    %c0_i32_1 = arith.constant 0 : i32
    return %c0_i32, %c0_i32_0 : i32, i32
  }
  func.func @transform_6(%arg0: i32, %arg1: i32) -> (i32, i32) {
    %c0_i32 = arith.constant 0 : i32
    %c0_i32_0 = arith.constant 0 : i32
    %c0_i32_1 = arith.constant 0 : i32
    return %c0_i32, %c0_i32_0 : i32, i32
  }
  func.func @transform_7(%arg0: i32, %arg1: i32) -> (i32, i32) {
    %c0_i32 = arith.constant 0 : i32
    %c0_i32_0 = arith.constant 0 : i32
    %c0_i32_1 = arith.constant 0 : i32
    return %c0_i32, %c0_i32_0 : i32, i32
  }
  func.func @transform_8(%arg0: i32, %arg1: i32) -> (i32, i32) {
    %c0_i32 = arith.constant 0 : i32
    %c0_i32_0 = arith.constant 0 : i32
    %c0_i32_1 = arith.constant 0 : i32
    return %c0_i32, %c0_i32_0 : i32, i32
  }
  func.func @transform_9(%arg0: i32, %arg1: i32) -> (i32, i32) {
    %c0_i32 = arith.constant 0 : i32
    %c0_i32_0 = arith.constant 0 : i32
    %c0_i32_1 = arith.constant 0 : i32
    return %c0_i32, %c0_i32_0 : i32, i32
  }
  func.func @transform_10(%arg0: i32, %arg1: i32) -> (i32, i32) {
    %c0_i32 = arith.constant 0 : i32
    %c0_i32_0 = arith.constant 0 : i32
    %c0_i32_1 = arith.constant 0 : i32
    return %c0_i32, %c0_i32_0 : i32, i32
  }
  func.func @transform_11(%arg0: i32, %arg1: i32) -> (i32, i32) {
    %c0_i32 = arith.constant 0 : i32
    %c0_i32_0 = arith.constant 0 : i32
    %c0_i32_1 = arith.constant 0 : i32
    return %c0_i32, %c0_i32_0 : i32, i32
  }
  func.func @transform_12(%arg0: i32, %arg1: i32) -> (i32, i32, i32) {
    %c0_i32 = arith.constant 0 : i32
    %c0_i32_0 = arith.constant 0 : i32
    return %arg0, %arg1, %c0_i32 : i32, i32, i32
  }
}

</mosaic_0001>

<bundles_post_ra>
// kernel: tpu_custom_call.1
= control target key start
LH: loop header
LB: loop body
LE: loop exit
PB: predicated region body
PF: predicated region fallthrough
CT: control target
= control target key end

     0   :  { %s3129_s0 = inlined_call_operand.hbm [shape: f32[2,8,32], index: 0, kind: input, shape index: {}]   ;;  %s3130_s1 = inlined_call_operand.hbm [shape: f32[2,8,32], index: 1, kind: input, shape index: {}]   ;;  %s3131_s2 = inlined_call_operand.hbm [shape: f32[2,8,32], index: 2, kind: input, shape index: {}]   ;;  %s3132_s3 = inlined_call_operand.vmem [shape: s8[2,8,8], index: 3, kind: input, shape index: {}]   ;;  %s3133_s4 = inlined_call_operand.hbm [shape: f32[32,32], index: 4, kind: input, shape index: {}]   ;;  %s3134_s5 = inlined_call_operand.vmem [shape: f32[1,32], index: 5, kind: input, shape index: {}]   ;;  %s3135_s6 = inlined_call_operand.hbm [shape: f32[32,32], index: 6, kind: input, shape index: {}]   ;;  %s3136_s7 = inlined_call_operand.vmem [shape: f32[1,32], index: 7, kind: input, shape index: {}]   ;;  %s3137_s8 = inlined_call_operand.hbm [shape: f32[32,32], index: 8, kind: input, shape index: {}]   ;;  %s3138_s9 = inlined_call_operand.vmem [shape: f32[1,32], index: 9, kind: input, shape index: {}]   ;;  %s3139_s10 = inlined_call_operand.hbm [shape: f32[32,32], index: 10, kind: input, shape index: {}]   ;;  %s3140_s11 = inlined_call_operand.vmem [shape: f32[1,32], index: 11, kind: input, shape index: {}]   ;;  %s3141_s12 = inlined_call_operand.hbm [shape: f32[2,8,32], index: 12, kind: output, shape index: {}]  }
   0x1   :  { %3160 = sst [smem:[#allocation29_spill]] %s3130_s1 }
   0x2   :  { %3161 = sst [smem:[#allocation30_spill]] %s3132_s3 }
   0x3   :  { %3162 = sst [smem:[#allocation31_spill]] %s3133_s4 }
   0x4   :  { %3163 = sst [smem:[#allocation32_spill]] %s3135_s6 }
   0x5   :  { %3164 = sst [smem:[#allocation33_spill]] %s3137_s8 }
   0x6   :  { %3165 = sst [smem:[#allocation34_spill]] %s3140_s11 }
   0x7   :  { %3166 = sst [smem:[#allocation35_spill]] %s3141_s12 }
   0x8   :  { %17 = vsyncpa [#allocation5], 0 }
   0x9   :  { %19 = vsyncpa [#allocation5 + $0x1], 0 }
   0xa   :  { %20 = vsyncpa [#allocation8], 0 }
   0xb   :  { %22 = vsyncpa [#allocation8 + $0x1], 0 }
   0xc   :  { %23 = vsyncpa [#allocation11], 0 }
   0xd   :  { %24 = vsyncpa [#allocation14], 0 }
   0xe   :  { %25 = vsyncpa [#allocation6], 0 }
   0xf   :  { %27 = vsyncpa [#allocation6 + $0x1], 0  ;;  %s2741_s21 = smov 0   ;;  %s2743_s22 = smov 0  }
  0x10   :  { %s2745_s23 = smov 0   ;;  %s2747_s24 = smov 0  }
  0x11   :  { %s2749_s25 = smov 0   ;;  %s2751_s26 = smov 0  }
  0x12 LB: > { %3167 = sst [smem:[#allocation22_spill]] %s2638_s21  ;;  %s2772_s27 = sadd.s32 4294967295, %s2658_s26   ;;  %s2658_s26 = sphi %s2751_s26, %s33_s26   ;;  %s2654_s25 = sphi %s2749_s25, %s3210_s25   ;;  %s2650_s24 = sphi %s2747_s24, %s3209_s24   ;;  %s2646_s23 = sphi %s2745_s23, %s3213_s23   ;;  %s2642_s22 = sphi %s2743_s22, %s3212_s22   ;;  %s2638_s21 = sphi %s2741_s21, %s3211_s21  }
  0x13   : > { %3168 = sst [smem:[#allocation23_spill]] %s2654_s25  ;;  %p2064_p0 = scmp.ge.s32.totalorder %s2658_s26, 1 }
  0x14   : > { %3169 = sst [smem:[#allocation24_spill]] %s2658_s26  ;;  %p3154_p1 = scmp.eq.s32.totalorder %s2772_s27, 0 }
  0x15   : > { %p354_p2 = scmp.lt.s32.totalorder %s2658_s26, 3  ;;  %s2660_s29 = smov [#allocation10]  }
  0x16   : > { %s366_s30 = sshll.u32 %s2660_s29, 4  ;;  %s2661_s14 = smov [#allocation13]   ;;  %s367_s30 = int_to_ptr.vmem [resolvable:$true] %s366_s30 }
  0x17   : > { %p2777_p3 = pnand %p2064_p0, %p354_p2  ;;  %s398_s15 = sshll.u32 %s2661_s14, 4  ;;  %s399_s15 = int_to_ptr.vmem [resolvable:$true] %s398_s15 }
  0x18   : > { %s2389_s16 = scalar_lea.vmem %s367_s30, 512  ;;  %p2397_p11 = scmp.lt.s32.totalorder %s367_s30, %s367_s30 }
  0x19   : > { %p2265_p4 = pneg %p2777_p3  ;;  %p2390_p8 = scmp.ne.s32.totalorder %s367_s30, %s2389_s16 }
  0x1a   : > { %p2398_p12 = scmp.lt.s32.totalorder %s2389_s16, %s2389_s16 }
  0x1b   : > { %p2786_p6 = pnand %p2265_p4, %p3154_p1 }
  0x1c   : > { %p2399_p13 = por %p2398_p12, %p2397_p11 }
  0x1d   : > { %p3155_p7 = pneg %p2786_p6 }
  0x1f   : > { %p2392_p9 = pnand %p2390_p8, %p3155_p7 }
  0x21   : > { %p2393_p10 = pneg %p2392_p9 }
  0x23   : > { %p2400_p0 = pnand %p2399_p13, %p2393_p10 }
  0x25   : > { %2403 = shalt.err (!%p2400_p0)
}
  0x26   : > { %s3142_s17 = smov 128   ;;  %s3144_s18 = smov 8  }
  0x27   : > { %s3172_s4 = sld [smem:[#allocation31_spill]]  ;;  %s2415_s29 = scalar_lea.vmem %s399_s15, 512 }
  0x28   : > { %p2416_p2 = scmp.ne.s32.totalorder %s399_s15, %s2415_s29  ;;  %p2423_p9 = scmp.lt.s32.totalorder %s399_s15, %s399_s15 }
  0x29   : > { %p2424_p10 = scmp.lt.s32.totalorder %s2415_s29, %s2415_s29 }
  0x2a   : > { %p2418_p4 = pnand %p2416_p2, %p3155_p7 }
  0x2b   : > { %p2425_p11 = por %p2424_p10, %p2423_p9 }
  0x2c   : > { %p2419_p8 = pneg %p2418_p4 }
  0x2d   : > { %2268 = dma.hbm_to_vmem [thread:$0]  (!%p2786_p6), %s3172_s4, 512, %s367_s30, [#allocation11], %s3142_s17, %s3142_s17, %s3144_s18  }
  0x2e   : > { %p2426_p12 = pnand %p2425_p11, %p2419_p8 }
  0x30   : > { %2429 = shalt.err (!%p2426_p12)
}
  0x31   : > { %s3173_s8 = sld [smem:[#allocation33_spill]]  ;;  %s2063_s30 = sadd.s32 4294967294, %s2658_s26  }
  0x32   : > { %s45_s19 = sadd.s32 1, %s2654_s25  ;;  %s54_s20 = sadd.s32 1, %s2646_s23 }
  0x33   : > { %p47_p13 = scmp.ge.s32.totalorder %s45_s19, 2  ;;  %p61_p0 = scmp.ne.s32.totalorder %s2646_s23, %s2642_s22 }
  0x34   : > { %p62_p2 = scmp.eq.s32.totalorder %s2658_s26, 0  ;;  %p67_p8 = scmp.ne.s32.totalorder %s2642_s22, %s2638_s21 }
  0x35   : > { %s3215_s19 = smov (%p47_p13, %s45_s19), 0  ;;  %p341_p9 = scmp.eq.s32.totalorder %s2772_s27, 1 }
  0x36   : > { %3174 = sst [smem:[#allocation25_spill]] %s3215_s19  ;;  %p2822_p4 = por %p62_p2, %p61_p0 }
  0x37   : > { %2274 = dma.hbm_to_vmem [thread:$0]  (!%p2786_p6), %s3173_s8, 512, %s399_s15, [#allocation14], %s3142_s17, %s3142_s17, %s3144_s18  }
  0x38   : > { %s49_s15 = ssub.s32 %s2654_s25, %s3215_s19  ;;  %p2833_p11 = por %p3154_p1, %p67_p8 }
  0x39   : > { %p52_p10 = scmp.eq.s32.totalorder %s49_s15, 0  ;;  %p2837_p12 = por %p341_p9, %p61_p0 }
  0x3a   : > { %p347_p13 = scmp.eq.s32.totalorder %s2063_s30, 1  ;;  %p2296_p5 = scmp.lt.s32.totalorder %s2658_s26, 2 }
  0x3b   : > { %s3177_s16 = scalar_select %p2837_p12, 1, 0 }
  0x3c   : > { %s2842_s17 = scalar_select %p52_p10, %s2646_s23, %s54_s20  }
  0x3d   : > { %3178 = sst [smem:[#allocation26_spill]] %s3177_s16  ;;  %p2844_p2 = por %p347_p13, %p67_p8 }
  0x3e   : > { %3179 = sst [smem:[#allocation27_spill]] %s2842_s17  ;;  %s3151_s4 = sand.u32 1, %s2646_s23  }
  0x3f   : > { %s3180_s18 = scalar_select %p2844_p2, 1, 0 }
  0x40   : > { %s2851_s8 = sshll.u32 %s2654_s25, 7  ;;  %s2855_s15 = sshll.u32 %s3151_s4, 3 }
  0x41   : > { %3181 = sst [smem:[#allocation28_spill]] %s3180_s18  ;;  %p2859_p0 = pnand %p2296_p5, %p2822_p4 }
  0x42   : > { %s450_s30 = sand.u32 1, %s2658_s26   ;;  %s3183_s1 = sld [smem:[#allocation29_spill]] }
  0x43   : > { %s454_s21 = scalar_lea.vmem [#allocation7], %s2855_s15  ;;  %s2869_s12 = scalar_lea.sflag [#allocation8], %s450_s30 }
  0x44   : > { %s461_s25 = sshll.u32 %s454_s21, 4  ;;  %p3156_p8 = pneg %p2859_p0  ;;  %s462_s25 = int_to_ptr.vmem [resolvable:$true] %s461_s25 }
  0x45   : > { %s2443_s29 = scalar_lea.vmem %s462_s25, 128  ;;  %s2664_s4 = smov [#allocation7]  }
  0x46   : > { %p2444_p9 = scmp.ne.s32.totalorder %s462_s25, %s2443_s29  ;;  %s2448_s11 = sshll.u32 %s2664_s4, 4  ;;  %s2449_s11 = int_to_ptr.vmem [resolvable:$false] %s2448_s11 }
  0x47   : > { %s2450_s26 = scalar_lea.vmem %s2449_s11, 256  ;;  %p2451_p10 = scmp.lt.s32.totalorder %s462_s25, %s2449_s11 }
  0x48   : > { %s459_s18 = scalar_lea.hbm %s3183_s1, %s2851_s8  ;;  %p2446_p5 = pnand %p2444_p9, %p3156_p8 }
  0x49   : > { %p2452_p13 = scmp.lt.s32.totalorder %s2450_s26, %s2443_s29 }
  0x4a   : > { %p2447_p4 = pneg %p2446_p5 }
  0x4b   : > { %p2453_p1 = por %p2452_p13, %p2451_p10 }
  0x4d   : > { %p2454_p7 = pnand %p2453_p1, %p2447_p4 }
  0x4f   : > { %2457 = shalt.err (!%p2454_p7)
}
  0x50   : > { %2284 = dma.hbm_to_vmem [thread:$0]  (!%p2859_p0), %s459_s18, 128, %s462_s25, %s2869_s12  }
  0x51   : > { %s2665_s21 = smov [#allocation12]   ;;  %s2666_s30 = smov [#allocation15]  }
  0x52   : > { %s382_s17 = sshll.u32 %s2665_s21, 4  ;;  %s414_s20 = sshll.u32 %s2666_s30, 4  ;;  %s383_s17 = int_to_ptr.vmem [resolvable:$true] %s382_s17  ;;  %s415_s20 = int_to_ptr.vmem [resolvable:$true] %s414_s20 }
  0x53   : > { %s2469_s1 = scalar_lea.vmem %s383_s17, 512  ;;  %p3184_p5 = pneg %p2786_p6 }
  0x54   : > { %p2470_p9 = scmp.ne.s32.totalorder %s383_s17, %s2469_s1  ;;  %p2477_p12 = scmp.lt.s32.totalorder %s383_s17, %s383_s17 }
  0x55   : > { %p2478_p10 = scmp.lt.s32.totalorder %s2469_s1, %s2469_s1 }
  0x56   : > { %p2472_p8 = pnand %p2470_p9, %p3184_p5 }
  0x57   : > { %p2479_p1 = por %p2478_p10, %p2477_p12 }
  0x58   : > { %p2473_p2 = pneg %p2472_p8 }
  0x5a   : > { %p2480_p7 = pnand %p2479_p1, %p2473_p2 }
  0x5c   : > { %2483 = shalt.err (!%p2480_p7)
}
  0x5d   : > { %s3185_s4 = smov 8   ;;  %s3186_s11 = smov 128  }
  0x5e   : > { %s3187_s6 = sld [smem:[#allocation32_spill]]  ;;  %s2495_s18 = scalar_lea.vmem %s415_s20, 512 }
  0x5f   : > { %p2496_p4 = scmp.ne.s32.totalorder %s415_s20, %s2495_s18  ;;  %p3188_p8 = pmov %p3184_p5 }
  0x60   : > { %p2503_p12 = scmp.lt.s32.totalorder %s415_s20, %s415_s20  ;;  %p2504_p2 = scmp.lt.s32.totalorder %s2495_s18, %s2495_s18 }
  0x61   : > { %p2498_p13 = pnand %p2496_p4, %p3188_p8 }
  0x62   : > { %p2505_p5 = por %p2504_p2, %p2503_p12 }
  0x63   : > { %p2499_p9 = pneg %p2498_p13 }
  0x64   : > { %2271 = dma.hbm_to_vmem [thread:$0]  (!%p2786_p6), %s3187_s6, 512, %s383_s17, [#allocation11], %s3186_s11, %s3186_s11, %s3185_s4  }
  0x65   : > { %p2506_p10 = pnand %p2505_p5, %p2499_p9 }
  0x67   : > { %2509 = shalt.err (!%p2506_p10)
}
  0x68   : > { %2277 = dma.hbm_to_vmem [thread:$0]  (!%p2786_p6), %s3139_s10, 512, %s415_s20, [#allocation14], %s3186_s11, %s3186_s11, %s3185_s4  }
  0x69   : > { %s441_s30 = scalar_lea.hbm %s3129_s0, %s2851_s8  ;;  %s435_s25 = scalar_lea.vmem [#allocation4], %s2855_s15 }
  0x6a   : > { %s443_s26 = sshll.u32 %s435_s25, 4  ;;  %s477_s6 = scalar_lea.hbm %s3131_s2, %s2851_s8  ;;  %s444_s26 = int_to_ptr.vmem [resolvable:$true] %s443_s26 }
  0x6b   : > { %s3189_s16 = sand.u32 1, %s2646_s23   ;;  %s2523_s1 = scalar_lea.vmem %s444_s26, 128 }
  0x6c   : > { %s432_s3 = scalar_lea.sflag [#allocation5], %s3189_s16  ;;  %p2524_p1 = scmp.ne.s32.totalorder %s444_s26, %s2523_s1 }
  0x6d   : > { %p3190_p7 = pneg %p2859_p0  ;;  %s2667_s20 = smov [#allocation4]  }
  0x6e   : > { %s2528_s4 = sshll.u32 %s2667_s20, 4  ;;  %s2529_s4 = int_to_ptr.vmem [resolvable:$false] %s2528_s4 }
  0x6f   : > { %p2526_p4 = pnand %p2524_p1, %p3190_p7  ;;  %s2530_s11 = scalar_lea.vmem %s2529_s4, 256 }
  0x70   : > { %p2531_p6 = scmp.lt.s32.totalorder %s444_s26, %s2529_s4  ;;  %p2532_p13 = scmp.lt.s32.totalorder %s2530_s11, %s2523_s1 }
  0x71   : > { %p2527_p8 = pneg %p2526_p4 }
  0x72   : > { %p2533_p9 = por %p2532_p13, %p2531_p6 }
  0x74   : > { %p2534_p12 = pnand %p2533_p9, %p2527_p8 }
  0x76   : > { %2537 = shalt.err (!%p2534_p12)
}
  0x77   : > { %2281 = dma.hbm_to_vmem [thread:$0]  (!%p2859_p0), %s441_s30, 128, %s444_s26, %s432_s3  }
  0x78   : > { %s472_s16 = scalar_lea.vmem [#allocation9], %s2855_s15  ;;  %p3191_p5 = pmov %p3190_p7 }
  0x79   : > { %s479_s29 = sshll.u32 %s472_s16, 4  ;;  %s2668_s17 = smov [#allocation9]   ;;  %s480_s29 = int_to_ptr.vmem [resolvable:$true] %s479_s29 }
  0x7a   : > { %s2551_s21 = scalar_lea.vmem %s480_s29, 128  ;;  %s2556_s25 = sshll.u32 %s2668_s17, 4  ;;  %s2557_s25 = int_to_ptr.vmem [resolvable:$false] %s2556_s25 }
  0x7b   : > { %p2552_p2 = scmp.ne.s32.totalorder %s480_s29, %s2551_s21  ;;  %s2558_s13 = scalar_lea.vmem %s2557_s25, 256 }
  0x7c   : > { %p2559_p7 = scmp.lt.s32.totalorder %s480_s29, %s2557_s25  ;;  %p2560_p4 = scmp.lt.s32.totalorder %s2558_s13, %s2551_s21 }
  0x7d   : > { %p2554_p10 = pnand %p2552_p2, %p3191_p5 }
  0x7e   : > { %p2561_p8 = por %p2560_p4, %p2559_p7 }
  0x7f   : > { %p2555_p1 = pneg %p2554_p10 }
  0x81   : > { %p2562_p6 = pnand %p2561_p8, %p2555_p1 }
  0x83   : > { %2565 = shalt.err (!%p2562_p6)
}
  0x84   : > { %2287 = dma.hbm_to_vmem [thread:$0]  (!%p2859_p0), %s477_s6, 128, %s480_s29, %s2869_s12  }
  0x85   : > { %498 = sbr.rel (%p2777_p3) target bundleno = 2658 (0xa62), region = 68  ;;  %s2932_s30 = sand.u32 (!%p2777_p3), 1, %s2642_s22  }
  0x86   : > { %s2935_s26 = sshll.u32 (!%p2777_p3), %s2932_s30, 3  ;;  %s501_s19 = scalar_lea.sflag (!%p2777_p3), [#allocation5], %s2932_s30 }
  0x87   : > { %s504_s18 = scalar_lea.vmem (!%p2777_p3), [#allocation4], %s2935_s26 }
  0x8a   : > { %2617 = dma.done.wait (%p2833_p11), %s501_s19, 128  }
  0x8b   : > { %2619 = vsyncadd (%p2833_p11), %s501_s19, 4294967168  ;;  %s509_s6 = sand.u32 1, %s2772_s27   ;;  %s513_s12 = scalar_lea.vmem [#allocation7], %s2935_s26 }
  0x8c   : > { %s510_s8 = scalar_lea.sflag [#allocation8], %s509_s6 }
  0x8d   : > { %2621 = dma.done.wait (%p2833_p11), %s510_s8, 256  }
  0x8e   : > { %2623 = vsyncadd (%p2833_p11), %s510_s8, 4294967040  ;;  %s522_s28 = scalar_lea.vmem [#allocation9], %s2935_s26  ;;  %p3192_p3 = scmp.eq.s32.totalorder %s2772_s27, 0 }
  0x90   : > { %2625 = dma.done.wait (%p3192_p3), [#allocation11], 1024   ;;  %p3193_p0 = pmov %p3192_p3 }
  0x92   : > { %2627 = vsyncadd (%p3193_p0), [#allocation11], 4294966272  ;;  %p3194_p13 = pmov %p3193_p0 }
  0x93   : > { %p3195_p9 = pmov %p3193_p0 }
  0x94   : > { %2629 = dma.done.wait (%p3194_p13), [#allocation14], 1024  }
  0x95   : > { %2631 = vsyncadd (%p3195_p9), [#allocation14], 4294966272  ;;  %v2669_v0 = vmov 0.0   ;;  %vm2670_vm0 = vmmov 0   ;;  %v613_v1 = vld [vmem:[#allocation12 + $0x18] sm:$0xff]  ;;  %v612_v2 = vld [vmem:[#allocation12 + $0x10] sm:$0xff] }
  0x96   : > { %2148 = vmatprep.subr.mxu0 %v2669_v0  ;;  %2156 = vmatprep.mubr.msk.f32.mxu0 %vm2670_vm0, %v2669_v0  ;;  %v611_v3 = vld [vmem:[#allocation12 + $0x8] sm:$0xff]  ;;  %v610_v4 = vld [vmem:[#allocation12] sm:$0xff]  ;;  %vm621_vm1 = vcmask 261120   ;;  %v822_v6 = vld [vmem:[#allocation10 + $0x18] sm:$0xff]  ;;  %s2671_s1 = smov 120   ;;  %vm812_vm2 = vcmask 64512  }
  0x97   : > { %2159 = vmatprep.subr.mxu1 %v2669_v0  ;;  %2167 = vmatprep.mubr.msk.f32.mxu1 %vm2670_vm0, %v2669_v0  ;;  %v609_v5 = vld [vmem:[%s513_s12] sm:$0xff]  ;;  %v821_v7 = vld [vmem:[#allocation10 + $0x10] sm:$0xff]  ;;  %v699_v11 = vld [vmem:[#allocation13 + $0x18] sm:$0xff]  ;;  %p596_p11 = scmp.lt.s32.totalorder %s2650_s24, 1  ;;  %s3196_s13 = sld [smem:[#allocation30_spill]]  ;;  %v2672_v35 = vmov 0  }
  0x98   : > { %2149 = vmatpush3.msra.mxu0 %v613_v1  ;;  %v820_v8 = vld [vmem:[#allocation10 + $0x8] sm:$0xff]  ;;  %v819_v9 = vld [vmem:[#allocation10] sm:$0xff]  ;;  %v818_v10 = vld [vmem:[%s504_s18] sm:$0xff]  ;;  %2160 = vmatpush3.msra.mxu1 %v699_v11  ;;  %s2673_s15 = smov 112   ;;  %s2674_s19 = smov 104  }
  0x99   : > { %2150 = vmatprep.subr.mxu0 %v2669_v0  ;;  %2161 = vmatprep.subr.mxu1 %v2669_v0  ;;  %v2090_v14 = vld [vmem:[%s3134_s5] ss:$0 sm:$0xff]  ;;  %v698_v18 = vld [vmem:[#allocation13 + $0x10] sm:$0xff]  ;;  %v696_v22 = vld [vmem:[#allocation13] sm:$0xff]  ;;  %s597_s29 = scalar_select %p596_p11, %s2650_s24, 1 }
  0x9a   : > { %2151 = vmatpush3.msra.mxu0 %v612_v2  ;;  %v2086_v19 = vld [vmem:[%s3136_s7] ss:$0 sm:$0xff]  ;;  %2162 = vmatpush3.msra.mxu1 %v698_v18  ;;  %v695_v23 = vld [vmem:[%s522_s28] sm:$0xff]  ;;  %s3199_s18 = sld [smem:[#allocation26_spill]]  ;;  %s2106_s28 = sshll.u32 %s2650_s24, 7 }
  0x9b   : > { %2152 = vmatprep.subr.mxu0 %v2669_v0  ;;  %2163 = vmatprep.subr.mxu1 %v2669_v0  ;;  %v697_v20 = vld [vmem:[#allocation13 + $0x8] sm:$0xff]  ;;  %s2085_s21 = sshll.u32 %s597_s29, 1  ;;  %s3200_s12 = sld [smem:[#allocation34_spill]] }
  0x9c   : > { %2153 = vmatpush3.msra.mxu0 %v611_v3  ;;  %2164 = vmatpush3.msra.mxu1 %v697_v20  ;;  %v2088_v29 = vld [vmem:[%s3138_s9] ss:$0 sm:$0xff]  ;;  %s595_s27 = scalar_lea.vmem [#allocation16], %s2935_s26  ;;  %s3201_s4 = sld [smem:[#allocation35_spill]] }
  0x9d   : > { %2154 = vmatprep.subr.mxu0 %v2669_v0  ;;  %2165 = vmatprep.subr.mxu1 %v2669_v0  ;;  %s602_s3 = scalar_lea.vmem %s3196_s13, %s2085_s21  ;;  %s1886_s14 = sshll.u32 %s595_s27, 4  ;;  %s1887_s14 = int_to_ptr.vmem [resolvable:$true] %s1886_s14 }
  0x9e   : > { %2155 = vmatpush3.msra.mxu0 %v610_v4  ;;  %2166 = vmatpush3.msra.mxu1 %v696_v22  ;;  %v904_v34 = vld [vmem:[%s602_s3] sm:$0x3]  ;;  %v1071_v4 = vld [vmem:[#allocation15] sm:$0xff]  ;;  %s1872_s16 = scalar_lea.sflag [#allocation6], %s2932_s30  ;;  %s2566_s29 = scalar_lea.vmem %s1887_s14, 128 }
  0x9f   : > { %2157 = vmatmul.mubr.msk.f32.vlgmr.msra.gmra.mxu0 %vm621_vm1, %v609_v5  ;;  %2170 = vmatprep.subr.mxu0 %v2669_v0  ;;  %vm905_vm3 = vnez %v904_v34  ;;  %v1237_v5 = vld [vmem:[#allocation15 + $0x8] sm:$0xff]  ;;  %p2567_p12 = scmp.ne.s32.totalorder %s1887_s14, %s2566_s29  ;;  %s2675_s21 = smov [#allocation16]  }
  0xa0   : > { %2171 = vmatpush3.msra.mxu0 %v822_v6  ;;  %2178 = vmatprep.mubr.msk.f32.mxu0 %vm2670_vm0, %v2669_v0  ;;  %v982_v36 = vsel %vm905_vm3, 16843009, %v2672_v35  ;;  %p3202_p2 = scmp.ne.s32.totalorder %s3199_s18, 0  ;;  %s2570_s24 = sshll.u32 %s2675_s21, 4  ;;  %s2571_s24 = int_to_ptr.vmem [resolvable:$false] %s2570_s24 }
  0xa1   : > { %2172 = vmatprep.subr.mxu0 %v2669_v0  ;;  %2168 = vmatmul.mubr.msk.f32.vlgmr.msra.gmra.mxu1 %vm621_vm1, %v695_v23  ;;  %v983_v37 = vunpack.c.0.s8 %v982_v36  ;;  %s2572_s26 = scalar_lea.vmem %s2571_s24, 256  ;;  %p2573_p1 = scmp.lt.s32.totalorder %s1887_s14, %s2571_s24 }
  0xa2   : > { %2173 = vmatpush3.msra.mxu0 %v821_v7  ;;  %2181 = vmatprep.subr.mxu1 %v2669_v0  ;;  %s1884_s11 = scalar_lea.hbm %s3201_s4, %s2106_s28  ;;  %p2568_p5 = pnand %p2567_p12, %p3202_p2 }
  0xa3   : > { %2174 = vmatprep.subr.mxu0 %v2669_v0  ;;  %2183 = vmatprep.mubr.msk.f32.mxu1 %vm2670_vm0, %v2669_v0  ;;  %vm3023_vm4 = vcmp.ne.s32.totalorder %v983_v37, 0  ;;  %p2574_p7 = scmp.lt.s32.totalorder %s2572_s26, %s2566_s29 }
  0xa4   : > { %2175 = vmatpush3.msra.mxu0 %v820_v8  ;;  %p2569_p10 = pneg %p2568_p5 }
  0xa5   : > { %2176 = vmatprep.subr.mxu0 %v2669_v0  ;;  %p2575_p4 = por %p2574_p7, %p2573_p1 }
  0xa6   : > { %2177 = vmatpush3.msra.mxu0 %v819_v9 }
  0xa7   : > { %2179 = vmatmul.mubr.msk.f32.vlgmr.msra.gmra.mxu0 %vm621_vm1, %v818_v10  ;;  %2191 = vmatprep.subr.mxu0 %v2669_v0  ;;  %p2576_p8 = pnand %p2575_p4, %p2569_p10 }
  0xa8   : > { %2193 = vmatprep.mubr.msk.f32.mxu0 %vm2670_vm0, %v2669_v0 }
 0x15f   : > { %v691_v12 = vpop.f32.mrf.mxu0 }
 0x160   : > { %v692_v21 = vadd.f32 %v2086_v19, %v691_v12 }
 0x161   : > { %v2158_v13 = vpop.f32.mrf.mxu0  ;;  %v776_v30 = vpop.f32.mrf.mxu1 }
 0x162   : > { %v777_v31 = vadd.f32 %v2088_v29, %v776_v30 }
 0x163   : > { %v2169_v32 = vpop.f32.mrf.mxu1 }
 0x164   : > { %817 = vst.msk [vmem:[#allocation3] sm:$0xff] %vm621_vm1, %v777_v31 }
 0x167   : > { %v900_v15 = vpop.f32.mrf.mxu0 }
 0x168   : > { %v2984_v16 = vadd.f32 %v2090_v14, %v900_v15 }
 0x169   : > { %v2180_v17 = vpop.f32.mrf.mxu0 }
 0x16a   : > { %1073 = vrot.lane.b32.xlu0 %v2984_v16, %s2671_s1 }
 0x16b   : > { %v3014_v33 = vld [vmem:[#allocation3] sm:$0xff] }
 0x188   : > { %780 = vxpose.xlu0.b32.start.end [1/1] (short) (narrow) %v692_v21, 32 }
 0x1dc   : > { %v1074_v24 = vpop.permute.xlu0 %1073 }
 0x204   : > { %v796_v25 = vpop.trf.xlu0 }
 0x205   : > { %813 = vst.msk [vmem:[#allocation2] sm:$0xff] %vm812_vm2, %v796_v25 }
 0x208   : > { %v797_v26 = vpop.trf.xlu0 }
 0x209   : > { %814 = vst.msk [vmem:[#allocation2 + $0x8] sm:$0xff] %vm812_vm2, %v797_v26 }
 0x20c   : > { %v906_v27 = vld [vmem:[#allocation2] sm:$0xff]  ;;  %v798_v59 = vpop.trf.xlu0 }
 0x20d   : > { %2182 = vmatpush3.msra.mxu1 %v906_v27  ;;  %815 = vst.msk [vmem:[#allocation2 + $0x10] sm:$0xff] %vm812_vm2, %v798_v59 }
 0x20e   : > { %2184 = vmatmul.mubr.msk.f32.vlgmr.msra.gmra.mxu1 %vm812_vm2, %v2984_v16  ;;  %2186 = vmatprep.subr.mxu1 %v2669_v0 }
 0x20f   : > { %2188 = vmatprep.mubr.msk.f32.mxu1 %vm2670_vm0, %v2669_v0  ;;  %2187 = vmatpush3.msra.mxu1 %v3014_v33 }
 0x210   : > { %v1072_v28 = vld [vmem:[#allocation2 + $0x8] sm:$0xff]  ;;  %2196 = vmatprep.subr.mxu1 %v2669_v0  ;;  %v799_v13 = vpop.trf.xlu0 }
 0x211   : > { %2192 = vmatpush3.msra.mxu0 %v1072_v28  ;;  %816 = vst.msk [vmem:[#allocation2 + $0x18] sm:$0xff] %vm812_vm2, %v799_v13 }
 0x212   : > { %2194 = vmatmul.mubr.msk.f32.vlgmr.msra.gmra.mxu0 %vm812_vm2, %v1074_v24  ;;  %2201 = vmatprep.subr.mxu0 %v2669_v0 }
 0x213   : > { %2203 = vmatprep.mubr.msk.f32.mxu0 %vm2670_vm0, %v2669_v0  ;;  %2202 = vmatpush3.msra.mxu0 %v1237_v5 }
 0x214   : > { %2211 = vmatprep.subr.mxu0 %v2669_v0  ;;  %v1384_v10 = vld [vmem:[#allocation2 + $0x10] sm:$0xff] }
 0x218   : > { %v1623_v34 = vld [vmem:[#allocation2 + $0x18] sm:$0xff] }
 0x2ce   : > { %v977_v38 = vpop.f32.mrf.mxu1 }
 0x2cf   : > { %v981_v40 = vmul.f32 0.35355338, %v977_v38 }
 0x2d0   : > { %v2185_v41 = vpop.f32.mrf.mxu1 }
 0x2d1   : > { %v985_v42 = vsel %vm3023_vm4, -1e+09, %v981_v40 }
 0x2d2   : > { %v1143_v43 = vpop.f32.mrf.mxu0  ;;  %v986_v44 = vsel %vm812_vm2, %v985_v42, -inf }
 0x2d3   : > { %v1147_v45 = vmul.f32 0.35355338, %v1143_v43  ;;  %987 = vmax.xlane.f32.xlu1 %v986_v44 }
 0x2d4   : > { %v2195_v46 = vpop.f32.mrf.mxu0 }
 0x2d5   : > { %v1148_v47 = vsel %vm3023_vm4, -1e+09, %v1147_v45 }
 0x2d6   : > { %v1149_v48 = vsel %vm812_vm2, %v1148_v47, -inf }
 0x2d7   : > { %1150 = vmax.xlane.f32.xlu1 %v1149_v48 }
 0x35c   : > { %v988_v49 = vpop.xlane.xlu1 %987 }
 0x35d   : > { %v989_v50 = vsub.f32 %v985_v42, %v988_v49 }
 0x35f   : > { %v990_v51 = vmul.f32 1.442695, %v989_v50 }
 0x360   : > { %v1151_v52 = vpop.xlane.xlu1 %1150 }
 0x361   : > { %2362 = vpow2.f32 %v990_v51  ;;  %v1152_v53 = vsub.f32 %v1148_v47, %v1151_v52 }
 0x363   : > { %v1153_v54 = vmul.f32 1.442695, %v1152_v53 }
 0x365   : > { %2364 = vpow2.f32 %v1153_v54 }
 0x36e   : > { %v2363_v55 = vpop.eup %2362 }
 0x36f   : > { %v992_v56 = vsel %vm812_vm2, %v2363_v55, 0.0 }
 0x370   : > { %993 = vadd.xlane.f32.xlu1 %v992_v56 }
 0x372   : > { %v2365_v57 = vpop.eup %2364 }
 0x373   : > { %v1155_v58 = vsel %vm812_vm2, %v2365_v57, 0.0 }
 0x374   : > { %1156 = vadd.xlane.f32.xlu1 %v1155_v58 }
 0x385   : > { %1161 = vrot.lane.b32.xlu1 %v3014_v33, %s2671_s1 }
 0x389   : > { %1385 = vrot.lane.b32.xlu1 %v2984_v16, %s2673_s15 }
 0x38d   : > { %1472 = vrot.lane.b32.xlu1 %v3014_v33, %s2673_s15 }
 0x3f9   : > { %v994_v60 = vpop.xlane.xlu1 %993 }
 0x3fa   : > { %2366 = vrcp.f32 %v994_v60 }
 0x3fd   : > { %v1157_v61 = vpop.xlane.xlu1 %1156 }
 0x3fe   : > { %2368 = vrcp.f32 %v1157_v61 }
 0x401   : > { %v1162_v1 = vpop.permute.xlu1 %1161 }
 0x405   : > { %v1386_v6 = vpop.permute.xlu1 %1385 }
 0x407   : > { %v2367_v62 = vpop.eup %2366 }
 0x408   : > { %v996_v63 = vmul.f32 %v2367_v62, %v2363_v55 }
 0x409   : > { %v1473_v8 = vpop.permute.xlu1 %1472 }
 0x40a   : > { %2189 = vmatmul.mubr.msk.f32.vlgmr.msra.gmra.mxu1 %vm812_vm2, %v996_v63 }
 0x40b   : > { %v2369_v2 = vpop.eup %2368  ;;  %2197 = vmatpush3.msra.mxu1 %v1162_v1  ;;  %2198 = vmatprep.mubr.msk.f32.mxu1 %vm2670_vm0, %v2669_v0 }
 0x40c   : > { %v1159_v3 = vmul.f32 %v2369_v2, %v2365_v57  ;;  %2206 = vmatprep.subr.mxu1 %v2669_v0  ;;  %v2104_v57 = vld [vmem:[%s3200_s12] ss:$0 sm:$0xff] }
 0x40e   : > { %2199 = vmatmul.mubr.msk.f32.vlgmr.msra.gmra.mxu1 %vm812_vm2, %v1159_v3 }
 0x40f   : > { %2207 = vmatpush3.msra.mxu1 %v1071_v4  ;;  %2208 = vmatprep.mubr.msk.f32.mxu1 %vm2670_vm0, %v2669_v0 }
 0x410   : > { %2216 = vmatprep.subr.mxu1 %v2669_v0 }
 0x4ca   : > { %v1067_v7 = vpop.f32.mrf.mxu1 }
 0x4cb   : > { %2209 = vmatmul.mubr.msk.f32.vlgmr.msra.gmra.mxu1 %vm812_vm2, %v1067_v7 }
 0x4cc   : > { %2217 = vmatpush3.msra.mxu1 %v1473_v8  ;;  %v2190_v9 = vpop.f32.mrf.mxu1  ;;  %2218 = vmatprep.mubr.msk.f32.mxu1 %vm2670_vm0, %v2669_v0 }
 0x4cd   : > { %2226 = vmatprep.subr.mxu1 %v2669_v0 }
 0x4ce   : > { %v1233_v11 = vpop.f32.mrf.mxu1 }
 0x4cf   : > { %2204 = vmatmul.mubr.msk.f32.vlgmr.msra.gmra.mxu0 %vm812_vm2, %v1233_v11 }
 0x4d0   : > { %v2200_v12 = vpop.f32.mrf.mxu1  ;;  %2212 = vmatpush3.msra.mxu0 %v1384_v10  ;;  %2213 = vmatprep.mubr.msk.f32.mxu0 %vm2670_vm0, %v2669_v0 }
 0x4d1   : > { %2221 = vmatprep.subr.mxu0 %v2669_v0 }
 0x4d3   : > { %2214 = vmatmul.mubr.msk.f32.vlgmr.msra.gmra.mxu0 %vm812_vm2, %v1386_v6 }
 0x4d4   : > { %2223 = vmatprep.mubr.msk.f32.mxu0 %vm2670_vm0, %v2669_v0 }
 0x58b   : > { %v1380_v14 = vpop.f32.mrf.mxu1 }
 0x58d   : > { %v2210_v15 = vpop.f32.mrf.mxu1 }
 0x58f   : > { %v1307_v17 = vpop.f32.mrf.mxu0 }
 0x590   : > { %v1381_v18 = vadd.f32 %v1380_v14, %v1307_v17 }
 0x591   : > { %v2205_v19 = vpop.f32.mrf.mxu0 }
 0x593   : > { %v1455_v20 = vpop.f32.mrf.mxu0 }
 0x594   : > { %v1459_v21 = vmul.f32 0.35355338, %v1455_v20 }
 0x595   : > { %v2215_v22 = vpop.f32.mrf.mxu0 }
 0x596   : > { %v1460_v23 = vsel %vm3023_vm4, -1e+09, %v1459_v21 }
 0x597   : > { %v1461_v24 = vsel %vm812_vm2, %v1460_v23, -inf }
 0x598   : > { %1462 = vmax.xlane.f32.xlu0 %v1461_v24 }
 0x621   : > { %v1463_v25 = vpop.xlane.xlu0 %1462 }
 0x622   : > { %v1464_v26 = vsub.f32 %v1460_v23, %v1463_v25 }
 0x624   : > { %v1465_v27 = vmul.f32 1.442695, %v1464_v26 }
 0x626   : > { %2370 = vpow2.f32 %v1465_v27 }
 0x633   : > { %v2371_v28 = vpop.eup %2370 }
 0x634   : > { %v1467_v29 = vsel %vm812_vm2, %v2371_v28, 0.0 }
 0x635   : > { %1468 = vadd.xlane.f32.xlu1 %v1467_v29 }
 0x646   : > { %1624 = vrot.lane.b32.xlu1 %v2984_v16, %s2674_s19  ;;  %v1548_v16 = vld [vmem:[#allocation15 + $0x10] sm:$0xff] }
 0x647   : > { %2222 = vmatpush3.msra.mxu0 %v1548_v16 }
 0x648   : > { %2231 = vmatprep.subr.mxu0 %v2669_v0 }
 0x6be   : > { %v1469_v30 = vpop.xlane.xlu1 %1468 }
 0x6bf   : > { %2372 = vrcp.f32 %v1469_v30 }
 0x6c2   : > { %v1625_v35 = vpop.permute.xlu1 %1624 }
 0x6cc   : > { %v2373_v31 = vpop.eup %2372 }
 0x6cd   : > { %v1471_v32 = vmul.f32 %v2373_v31, %v2371_v28 }
 0x6cf   : > { %2219 = vmatmul.mubr.msk.f32.vlgmr.msra.gmra.mxu1 %vm812_vm2, %v1471_v32 }
 0x6d0   : > { %2227 = vmatpush3.msra.mxu1 %v1623_v34  ;;  %2228 = vmatprep.mubr.msk.f32.mxu1 %vm2670_vm0, %v2669_v0 }
 0x6d1   : > { %2236 = vmatprep.subr.mxu1 %v2669_v0 }
 0x6d3   : > { %2229 = vmatmul.mubr.msk.f32.vlgmr.msra.gmra.mxu1 %vm812_vm2, %v1625_v35 }
 0x6d4   : > { %2238 = vmatprep.mubr.msk.f32.mxu1 %vm2670_vm0, %v2669_v0 }
 0x78f   : > { %v1544_v36 = vpop.f32.mrf.mxu1 }
 0x790   : > { %2224 = vmatmul.mubr.msk.f32.vlgmr.msra.gmra.mxu0 %vm812_vm2, %v1544_v36 }
 0x791   : > { %v2220_v37 = vpop.f32.mrf.mxu1  ;;  %2233 = vmatprep.mubr.msk.f32.mxu0 %vm2670_vm0, %v2669_v0 }
 0x793   : > { %v1694_v38 = vpop.f32.mrf.mxu1 }
 0x794   : > { %v1698_v40 = vmul.f32 0.35355338, %v1694_v38 }
 0x795   : > { %v2230_v41 = vpop.f32.mrf.mxu1 }
 0x796   : > { %v1699_v42 = vsel %vm3023_vm4, -1e+09, %v1698_v40 }
 0x797   : > { %v1700_v43 = vsel %vm812_vm2, %v1699_v42, -inf }
 0x798   : > { %1701 = vmax.xlane.f32.xlu0 %v1700_v43 }
 0x7ae   : > { %1711 = vrot.lane.b32.xlu0 %v3014_v33, %s2674_s19  ;;  %v1787_v33 = vld [vmem:[#allocation15 + $0x18] sm:$0xff] }
 0x7af   : > { %2237 = vmatpush3.msra.mxu1 %v1787_v33 }
 0x821   : > { %v1702_v44 = vpop.xlane.xlu0 %1701 }
 0x822   : > { %v1703_v45 = vsub.f32 %v1699_v42, %v1702_v44 }
 0x824   : > { %v1704_v46 = vmul.f32 1.442695, %v1703_v45 }
 0x825   : > { %v1712_v47 = vpop.permute.xlu0 %1711 }
 0x826   : > { %2374 = vpow2.f32 %v1704_v46  ;;  %2232 = vmatpush3.msra.mxu0 %v1712_v47 }
 0x833   : > { %v2375_v48 = vpop.eup %2374 }
 0x834   : > { %v1706_v0 = vsel %vm812_vm2, %v2375_v48, 0.0 }
 0x835   : > { %1707 = vadd.xlane.f32.xlu1 %v1706_v0 }
 0x850   : > { %v1618_v49 = vpop.f32.mrf.mxu0 }
 0x851   : > { %v1622_v39 = vadd.f32 %v1618_v49, %v1381_v18 }
 0x852   : > { %v2225_v50 = vpop.f32.mrf.mxu0 }
 0x8be   : > { %v1708_v51 = vpop.xlane.xlu1 %1707 }
 0x8bf   : > { %2376 = vrcp.f32 %v1708_v51 }
 0x8cc   : > { %v2377_v52 = vpop.eup %2376 }
 0x8cd   : > { %v1710_v53 = vmul.f32 %v2377_v52, %v2375_v48 }
 0x8cf   : > { %2234 = vmatmul.mubr.msk.f32.vlgmr.msra.gmra.mxu0 %vm812_vm2, %v1710_v53 }
 0x98f   : > { %v1783_v54 = vpop.f32.mrf.mxu0 }
 0x990   : > { %2239 = vmatmul.mubr.msk.f32.vlgmr.msra.gmra.mxu1 %vm812_vm2, %v1783_v54 }
 0x991   : > { %v2235_v55 = vpop.f32.mrf.mxu0 }
 0xa50   : > { %v1857_v56 = vpop.f32.mrf.mxu1 }
 0xa51   : > { %v1861_v58 = vadd.f32 %v1857_v56, %v1622_v39 }
 0xa52   : > { %v2240_v59 = vpop.f32.mrf.mxu1 }
 0xa53   : > { %v1869_v60 = vadd.f32 %v2104_v57, %v1861_v58 }
 0xa55   : > { %1870 = vst.msk [vmem:[%s595_s27] sm:$0xff] %vm621_vm1, %v1869_v60 }
 0xa56   : > { %2579 = shalt.err (!%p2576_p8)
}
 0xa57   : > { %s2580_s17 = scalar_lea.hbm %s1884_s11, 128  ;;  %s2584_s13 = scalar_lea.hbm %s3201_s4, 256 }
 0xa58   : > { %p2581_p6 = scmp.ne.s32.totalorder %s1884_s11, %s2580_s17  ;;  %p2585_p13 = scmp.lt.s32.totalorder %s1884_s11, %s3201_s4 }
 0xa59   : > { %p2586_p9 = scmp.lt.s32.totalorder %s2584_s13, %s2580_s17 }
 0xa5a   : > { %p2582_p3 = pnand %p2581_p6, %p3202_p2 }
 0xa5b   : > { %p2587_p11 = por %p2586_p9, %p2585_p13 }
 0xa5c   : > { %p2583_p0 = pneg %p2582_p3 }
 0xa5e   : > { %p2588_p12 = pnand %p2587_p11, %p2583_p0 }
 0xa60   : > { %2591 = shalt.err (!%p2588_p12)
}
 0xa61   : > { %2263 = dma.vmem_to_hbm [thread:$0]  (%p3202_p2), %s1887_s14, 128, %s1884_s11, %s1872_s16  }
 0xa62 PF: > { %s3203_s19 = sld [smem:[#allocation22_spill]] }
 0xa63   : > { %s3204_s6 = sld [smem:[#allocation28_spill]] }
 0xa64   : > { %s3205_s8 = sld [smem:[#allocation24_spill]] }
 0xa68   : > { %s1898_s12 = sand.u32 1, %s3203_s19  }
 0xa69   : > { %p3206_p5 = scmp.ne.s32.totalorder %s3204_s6, 0  ;;  %s1899_s28 = scalar_lea.sflag [#allocation6], %s1898_s12 }
 0xa6a   : > { %p3207_p10 = scmp.ge.s32.totalorder %s3205_s8, 2 }
 0xa6c   : > { %p2289_p1 = pnand %p3207_p10, %p3206_p5 }
 0xa6e   : > { %p2290_p7 = pneg %p2289_p1 }
 0xa70   : > { %2633 = dma.done.wait (%p2290_p7), %s1899_s28, 128  }
 0xa71   : > { %2635 = vsyncadd (%p2290_p7), %s1899_s28, 4294967168  ;;  %s33_s26 = sadd.s32 1, %s3205_s8   ;;  %s3208_s27 = sld [smem:[#allocation27_spill]] }
 0xa72   : > { %p30_p4 = scmp.ge.s32.totalorder %s33_s26, 4   ;;  %s3209_s24 = sld [smem:[#allocation23_spill]] }
 0xa73   : > { %s3210_s25 = sld [smem:[#allocation25_spill]]  ;;  %s3211_s21 = smov %s2642_s22 }
 0xa74   : > { %s3212_s22 = smov %s2646_s23  ;;  %32 = sbr.rel (!%p30_p4) target bundleno = 18 (0x12), region = 160 }
 0xa77   : > { %s3213_s23 = smov %s3208_s27 }
 0xa79   :  { %1904 = vsyncpa [#allocation5], 1 }
 0xa7a   :  { %1906 = vsyncpa [#allocation5 + $0x1], 1 }
 0xa7b   :  { %1907 = vsyncpa [#allocation8], 1 }
 0xa7c   :  { %1909 = vsyncpa [#allocation8 + $0x1], 1 }
 0xa7d   :  { %1910 = vsyncpa [#allocation11], 1 }
 0xa7e   :  { %1911 = vsyncpa [#allocation14], 1 }
 0xa7f   :  { %1912 = vsyncpa [#allocation6], 1 }
 0xa80   :  { %1914 = vsyncpa [#allocation6 + $0x1], 1 }

// kernel: tpu_custom_call.1
= control target key start
LH: loop header
LB: loop body
LE: loop exit
PB: predicated region body
PF: predicated region fallthrough
CT: control target
= control target key end

     0   :  { %s3129_s0 = inlined_call_operand.hbm [shape: f32[2,8,32], index: 0, kind: input, shape index: {}]   ;;  %s3130_s1 = inlined_call_operand.hbm [shape: f32[2,8,32], index: 1, kind: input, shape index: {}]   ;;  %s3131_s2 = inlined_call_operand.hbm [shape: f32[2,8,32], index: 2, kind: input, shape index: {}]   ;;  %s3132_s3 = inlined_call_operand.vmem [shape: s8[2,8,8], index: 3, kind: input, shape index: {}]   ;;  %s3133_s4 = inlined_call_operand.hbm [shape: f32[32,32], index: 4, kind: input, shape index: {}]   ;;  %s3134_s5 = inlined_call_operand.vmem [shape: f32[1,32], index: 5, kind: input, shape index: {}]   ;;  %s3135_s6 = inlined_call_operand.hbm [shape: f32[32,32], index: 6, kind: input, shape index: {}]   ;;  %s3136_s7 = inlined_call_operand.vmem [shape: f32[1,32], index: 7, kind: input, shape index: {}]   ;;  %s3137_s8 = inlined_call_operand.hbm [shape: f32[32,32], index: 8, kind: input, shape index: {}]   ;;  %s3138_s9 = inlined_call_operand.vmem [shape: f32[1,32], index: 9, kind: input, shape index: {}]   ;;  %s3139_s10 = inlined_call_operand.hbm [shape: f32[32,32], index: 10, kind: input, shape index: {}]   ;;  %s3140_s11 = inlined_call_operand.vmem [shape: f32[1,32], index: 11, kind: input, shape index: {}]   ;;  %s3141_s12 = inlined_call_operand.hbm [shape: f32[2,8,32], index: 12, kind: output, shape index: {}]  }
   0x1   :  { %3160 = sst [smem:[#allocation29_spill]] %s3130_s1 }
   0x2   :  { %3161 = sst [smem:[#allocation30_spill]] %s3132_s3 }
   0x3   :  { %3162 = sst [smem:[#allocation31_spill]] %s3133_s4 }
   0x4   :  { %3163 = sst [smem:[#allocation32_spill]] %s3135_s6 }
   0x5   :  { %3164 = sst [smem:[#allocation33_spill]] %s3137_s8 }
   0x6   :  { %3165 = sst [smem:[#allocation34_spill]] %s3140_s11 }
   0x7   :  { %3166 = sst [smem:[#allocation35_spill]] %s3141_s12 }
   0x8   :  { %17 = vsyncpa [#allocation5], 0 }
   0x9   :  { %19 = vsyncpa [#allocation5 + $0x1], 0 }
   0xa   :  { %20 = vsyncpa [#allocation8], 0 }
   0xb   :  { %22 = vsyncpa [#allocation8 + $0x1], 0 }
   0xc   :  { %23 = vsyncpa [#allocation11], 0 }
   0xd   :  { %24 = vsyncpa [#allocation14], 0 }
   0xe   :  { %25 = vsyncpa [#allocation6], 0 }
   0xf   :  { %27 = vsyncpa [#allocation6 + $0x1], 0  ;;  %s2741_s21 = smov 0   ;;  %s2743_s22 = smov 0  }
  0x10   :  { %s2745_s23 = smov 0   ;;  %s2747_s24 = smov 0  }
  0x11   :  { %s2749_s25 = smov 0   ;;  %s2751_s26 = smov 0  }
  0x12 LB: > { %3167 = sst [smem:[#allocation22_spill]] %s2638_s21  ;;  %s2772_s27 = sadd.s32 4294967295, %s2658_s26   ;;  %s2658_s26 = sphi %s2751_s26, %s33_s26   ;;  %s2654_s25 = sphi %s2749_s25, %s3210_s25   ;;  %s2650_s24 = sphi %s2747_s24, %s3209_s24   ;;  %s2646_s23 = sphi %s2745_s23, %s3213_s23   ;;  %s2642_s22 = sphi %s2743_s22, %s3212_s22   ;;  %s2638_s21 = sphi %s2741_s21, %s3211_s21  }
  0x13   : > { %3168 = sst [smem:[#allocation23_spill]] %s2654_s25  ;;  %p2064_p0 = scmp.ge.s32.totalorder %s2658_s26, 1 }
  0x14   : > { %3169 = sst [smem:[#allocation24_spill]] %s2658_s26  ;;  %p3154_p1 = scmp.eq.s32.totalorder %s2772_s27, 0 }
  0x15   : > { %p354_p2 = scmp.lt.s32.totalorder %s2658_s26, 3  ;;  %s2660_s29 = smov [#allocation10]  }
  0x16   : > { %s366_s30 = sshll.u32 %s2660_s29, 4  ;;  %s2661_s14 = smov [#allocation13]   ;;  %s367_s30 = int_to_ptr.vmem [resolvable:$true] %s366_s30 }
  0x17   : > { %p2777_p3 = pnand %p2064_p0, %p354_p2  ;;  %s398_s15 = sshll.u32 %s2661_s14, 4  ;;  %s399_s15 = int_to_ptr.vmem [resolvable:$true] %s398_s15 }
  0x18   : > { %s2389_s16 = scalar_lea.vmem %s367_s30, 512  ;;  %p2397_p11 = scmp.lt.s32.totalorder %s367_s30, %s367_s30 }
  0x19   : > { %p2265_p4 = pneg %p2777_p3  ;;  %p2390_p8 = scmp.ne.s32.totalorder %s367_s30, %s2389_s16 }
  0x1a   : > { %p2398_p12 = scmp.lt.s32.totalorder %s2389_s16, %s2389_s16 }
  0x1b   : > { %p2786_p6 = pnand %p2265_p4, %p3154_p1 }
  0x1c   : > { %p2399_p13 = por %p2398_p12, %p2397_p11 }
  0x1d   : > { %p3155_p7 = pneg %p2786_p6 }
  0x1f   : > { %p2392_p9 = pnand %p2390_p8, %p3155_p7 }
  0x21   : > { %p2393_p10 = pneg %p2392_p9 }
  0x23   : > { %p2400_p0 = pnand %p2399_p13, %p2393_p10 }
  0x25   : > { %2403 = shalt.err (!%p2400_p0)
}
  0x26   : > { %s3142_s17 = smov 128   ;;  %s3144_s18 = smov 8  }
  0x27   : > { %s3172_s4 = sld [smem:[#allocation31_spill]]  ;;  %s2415_s29 = scalar_lea.vmem %s399_s15, 512 }
  0x28   : > { %p2416_p2 = scmp.ne.s32.totalorder %s399_s15, %s2415_s29  ;;  %p2423_p9 = scmp.lt.s32.totalorder %s399_s15, %s399_s15 }
  0x29   : > { %p2424_p10 = scmp.lt.s32.totalorder %s2415_s29, %s2415_s29 }
  0x2a   : > { %p2418_p4 = pnand %p2416_p2, %p3155_p7 }
  0x2b   : > { %p2425_p11 = por %p2424_p10, %p2423_p9 }
  0x2c   : > { %p2419_p8 = pneg %p2418_p4 }
  0x2d   : > { %2268 = dma.hbm_to_vmem [thread:$0]  (!%p2786_p6), %s3172_s4, 512, %s367_s30, [#allocation11], %s3142_s17, %s3142_s17, %s3144_s18  }
  0x2e   : > { %p2426_p12 = pnand %p2425_p11, %p2419_p8 }
  0x30   : > { %2429 = shalt.err (!%p2426_p12)
}
  0x31   : > { %s3173_s8 = sld [smem:[#allocation33_spill]]  ;;  %s2063_s30 = sadd.s32 4294967294, %s2658_s26  }
  0x32   : > { %s45_s19 = sadd.s32 1, %s2654_s25  ;;  %s54_s20 = sadd.s32 1, %s2646_s23 }
  0x33   : > { %p47_p13 = scmp.ge.s32.totalorder %s45_s19, 2  ;;  %p61_p0 = scmp.ne.s32.totalorder %s2646_s23, %s2642_s22 }
  0x34   : > { %p62_p2 = scmp.eq.s32.totalorder %s2658_s26, 0  ;;  %p67_p8 = scmp.ne.s32.totalorder %s2642_s22, %s2638_s21 }
  0x35   : > { %s3215_s19 = smov (%p47_p13, %s45_s19), 0  ;;  %p341_p9 = scmp.eq.s32.totalorder %s2772_s27, 1 }
  0x36   : > { %3174 = sst [smem:[#allocation25_spill]] %s3215_s19  ;;  %p2822_p4 = por %p62_p2, %p61_p0 }
  0x37   : > { %2274 = dma.hbm_to_vmem [thread:$0]  (!%p2786_p6), %s3173_s8, 512, %s399_s15, [#allocation14], %s3142_s17, %s3142_s17, %s3144_s18  }
  0x38   : > { %s49_s15 = ssub.s32 %s2654_s25, %s3215_s19  ;;  %p2833_p11 = por %p3154_p1, %p67_p8 }
  0x39   : > { %p52_p10 = scmp.eq.s32.totalorder %s49_s15, 0  ;;  %p2837_p12 = por %p341_p9, %p61_p0 }
  0x3a   : > { %p347_p13 = scmp.eq.s32.totalorder %s2063_s30, 1  ;;  %p2296_p5 = scmp.lt.s32.totalorder %s2658_s26, 2 }
  0x3b   : > { %s3177_s16 = scalar_select %p2837_p12, 1, 0 }
  0x3c   : > { %s2842_s17 = scalar_select %p52_p10, %s2646_s23, %s54_s20  }
  0x3d   : > { %3178 = sst [smem:[#allocation26_spill]] %s3177_s16  ;;  %p2844_p2 = por %p347_p13, %p67_p8 }
  0x3e   : > { %3179 = sst [smem:[#allocation27_spill]] %s2842_s17  ;;  %s3151_s4 = sand.u32 1, %s2646_s23  }
  0x3f   : > { %s3180_s18 = scalar_select %p2844_p2, 1, 0 }
  0x40   : > { %s2851_s8 = sshll.u32 %s2654_s25, 7  ;;  %s2855_s15 = sshll.u32 %s3151_s4, 3 }
  0x41   : > { %3181 = sst [smem:[#allocation28_spill]] %s3180_s18  ;;  %p2859_p0 = pnand %p2296_p5, %p2822_p4 }
  0x42   : > { %s450_s30 = sand.u32 1, %s2658_s26   ;;  %s3183_s1 = sld [smem:[#allocation29_spill]] }
  0x43   : > { %s454_s21 = scalar_lea.vmem [#allocation7], %s2855_s15  ;;  %s2869_s12 = scalar_lea.sflag [#allocation8], %s450_s30 }
  0x44   : > { %s461_s25 = sshll.u32 %s454_s21, 4  ;;  %p3156_p8 = pneg %p2859_p0  ;;  %s462_s25 = int_to_ptr.vmem [resolvable:$true] %s461_s25 }
  0x45   : > { %s2443_s29 = scalar_lea.vmem %s462_s25, 128  ;;  %s2664_s4 = smov [#allocation7]  }
  0x46   : > { %p2444_p9 = scmp.ne.s32.totalorder %s462_s25, %s2443_s29  ;;  %s2448_s11 = sshll.u32 %s2664_s4, 4  ;;  %s2449_s11 = int_to_ptr.vmem [resolvable:$false] %s2448_s11 }
  0x47   : > { %s2450_s26 = scalar_lea.vmem %s2449_s11, 256  ;;  %p2451_p10 = scmp.lt.s32.totalorder %s462_s25, %s2449_s11 }
  0x48   : > { %s459_s18 = scalar_lea.hbm %s3183_s1, %s2851_s8  ;;  %p2446_p5 = pnand %p2444_p9, %p3156_p8 }
  0x49   : > { %p2452_p13 = scmp.lt.s32.totalorder %s2450_s26, %s2443_s29 }
  0x4a   : > { %p2447_p4 = pneg %p2446_p5 }
  0x4b   : > { %p2453_p1 = por %p2452_p13, %p2451_p10 }
  0x4d   : > { %p2454_p7 = pnand %p2453_p1, %p2447_p4 }
  0x4f   : > { %2457 = shalt.err (!%p2454_p7)
}
  0x50   : > { %2284 = dma.hbm_to_vmem [thread:$0]  (!%p2859_p0), %s459_s18, 128, %s462_s25, %s2869_s12  }
  0x51   : > { %s2665_s21 = smov [#allocation12]   ;;  %s2666_s30 = smov [#allocation15]  }
  0x52   : > { %s382_s17 = sshll.u32 %s2665_s21, 4  ;;  %s414_s20 = sshll.u32 %s2666_s30, 4  ;;  %s383_s17 = int_to_ptr.vmem [resolvable:$true] %s382_s17  ;;  %s415_s20 = int_to_ptr.vmem [resolvable:$true] %s414_s20 }
  0x53   : > { %s2469_s1 = scalar_lea.vmem %s383_s17, 512  ;;  %p3184_p5 = pneg %p2786_p6 }
  0x54   : > { %p2470_p9 = scmp.ne.s32.totalorder %s383_s17, %s2469_s1  ;;  %p2477_p12 = scmp.lt.s32.totalorder %s383_s17, %s383_s17 }
  0x55   : > { %p2478_p10 = scmp.lt.s32.totalorder %s2469_s1, %s2469_s1 }
  0x56   : > { %p2472_p8 = pnand %p2470_p9, %p3184_p5 }
  0x57   : > { %p2479_p1 = por %p2478_p10, %p2477_p12 }
  0x58   : > { %p2473_p2 = pneg %p2472_p8 }
  0x5a   : > { %p2480_p7 = pnand %p2479_p1, %p2473_p2 }
  0x5c   : > { %2483 = shalt.err (!%p2480_p7)
}
  0x5d   : > { %s3185_s4 = smov 8   ;;  %s3186_s11 = smov 128  }
  0x5e   : > { %s3187_s6 = sld [smem:[#allocation32_spill]]  ;;  %s2495_s18 = scalar_lea.vmem %s415_s20, 512 }
  0x5f   : > { %p2496_p4 = scmp.ne.s32.totalorder %s415_s20, %s2495_s18  ;;  %p3188_p8 = pmov %p3184_p5 }
  0x60   : > { %p2503_p12 = scmp.lt.s32.totalorder %s415_s20, %s415_s20  ;;  %p2504_p2 = scmp.lt.s32.totalorder %s2495_s18, %s2495_s18 }
  0x61   : > { %p2498_p13 = pnand %p2496_p4, %p3188_p8 }
  0x62   : > { %p2505_p5 = por %p2504_p2, %p2503_p12 }
  0x63   : > { %p2499_p9 = pneg %p2498_p13 }
  0x64   : > { %2271 = dma.hbm_to_vmem [thread:$0]  (!%p2786_p6), %s3187_s6, 512, %s383_s17, [#allocation11], %s3186_s11, %s3186_s11, %s3185_s4  }
  0x65   : > { %p2506_p10 = pnand %p2505_p5, %p2499_p9 }
  0x67   : > { %2509 = shalt.err (!%p2506_p10)
}
  0x68   : > { %2277 = dma.hbm_to_vmem [thread:$0]  (!%p2786_p6), %s3139_s10, 512, %s415_s20, [#allocation14], %s3186_s11, %s3186_s11, %s3185_s4  }
  0x69   : > { %s441_s30 = scalar_lea.hbm %s3129_s0, %s2851_s8  ;;  %s435_s25 = scalar_lea.vmem [#allocation4], %s2855_s15 }
  0x6a   : > { %s443_s26 = sshll.u32 %s435_s25, 4  ;;  %s477_s6 = scalar_lea.hbm %s3131_s2, %s2851_s8  ;;  %s444_s26 = int_to_ptr.vmem [resolvable:$true] %s443_s26 }
  0x6b   : > { %s3189_s16 = sand.u32 1, %s2646_s23   ;;  %s2523_s1 = scalar_lea.vmem %s444_s26, 128 }
  0x6c   : > { %s432_s3 = scalar_lea.sflag [#allocation5], %s3189_s16  ;;  %p2524_p1 = scmp.ne.s32.totalorder %s444_s26, %s2523_s1 }
  0x6d   : > { %p3190_p7 = pneg %p2859_p0  ;;  %s2667_s20 = smov [#allocation4]  }
  0x6e   : > { %s2528_s4 = sshll.u32 %s2667_s20, 4  ;;  %s2529_s4 = int_to_ptr.vmem [resolvable:$false] %s2528_s4 }
  0x6f   : > { %p2526_p4 = pnand %p2524_p1, %p3190_p7  ;;  %s2530_s11 = scalar_lea.vmem %s2529_s4, 256 }
  0x70   : > { %p2531_p6 = scmp.lt.s32.totalorder %s444_s26, %s2529_s4  ;;  %p2532_p13 = scmp.lt.s32.totalorder %s2530_s11, %s2523_s1 }
  0x71   : > { %p2527_p8 = pneg %p2526_p4 }
  0x72   : > { %p2533_p9 = por %p2532_p13, %p2531_p6 }
  0x74   : > { %p2534_p12 = pnand %p2533_p9, %p2527_p8 }
  0x76   : > { %2537 = shalt.err (!%p2534_p12)
}
  0x77   : > { %2281 = dma.hbm_to_vmem [thread:$0]  (!%p2859_p0), %s441_s30, 128, %s444_s26, %s432_s3  }
  0x78   : > { %s472_s16 = scalar_lea.vmem [#allocation9], %s2855_s15  ;;  %p3191_p5 = pmov %p3190_p7 }
  0x79   : > { %s479_s29 = sshll.u32 %s472_s16, 4  ;;  %s2668_s17 = smov [#allocation9]   ;;  %s480_s29 = int_to_ptr.vmem [resolvable:$true] %s479_s29 }
  0x7a   : > { %s2551_s21 = scalar_lea.vmem %s480_s29, 128  ;;  %s2556_s25 = sshll.u32 %s2668_s17, 4  ;;  %s2557_s25 = int_to_ptr.vmem [resolvable:$false] %s2556_s25 }
  0x7b   : > { %p2552_p2 = scmp.ne.s32.totalorder %s480_s29, %s2551_s21  ;;  %s2558_s13 = scalar_lea.vmem %s2557_s25, 256 }
  0x7c   : > { %p2559_p7 = scmp.lt.s32.totalorder %s480_s29, %s2557_s25  ;;  %p2560_p4 = scmp.lt.s32.totalorder %s2558_s13, %s2551_s21 }
  0x7d   : > { %p2554_p10 = pnand %p2552_p2, %p3191_p5 }
  0x7e   : > { %p2561_p8 = por %p2560_p4, %p2559_p7 }
  0x7f   : > { %p2555_p1 = pneg %p2554_p10 }
  0x81   : > { %p2562_p6 = pnand %p2561_p8, %p2555_p1 }
  0x83   : > { %2565 = shalt.err (!%p2562_p6)
}
  0x84   : > { %2287 = dma.hbm_to_vmem [thread:$0]  (!%p2859_p0), %s477_s6, 128, %s480_s29, %s2869_s12  }
  0x85   : > { %498 = sbr.rel (%p2777_p3) target bundleno = 2658 (0xa62), region = 68  ;;  %s2932_s30 = sand.u32 (!%p2777_p3), 1, %s2642_s22  }
  0x86   : > { %s2935_s26 = sshll.u32 (!%p2777_p3), %s2932_s30, 3  ;;  %s501_s19 = scalar_lea.sflag (!%p2777_p3), [#allocation5], %s2932_s30 }
  0x87   : > { %s504_s18 = scalar_lea.vmem (!%p2777_p3), [#allocation4], %s2935_s26 }
  0x8a   : > { %2617 = dma.done.wait (%p2833_p11), %s501_s19, 128  }
  0x8b   : > { %2619 = vsyncadd (%p2833_p11), %s501_s19, 4294967168  ;;  %s509_s6 = sand.u32 1, %s2772_s27   ;;  %s513_s12 = scalar_lea.vmem [#allocation7], %s2935_s26 }
  0x8c   : > { %s510_s8 = scalar_lea.sflag [#allocation8], %s509_s6 }
  0x8d   : > { %2621 = dma.done.wait (%p2833_p11), %s510_s8, 256  }
  0x8e   : > { %2623 = vsyncadd (%p2833_p11), %s510_s8, 4294967040  ;;  %s522_s28 = scalar_lea.vmem [#allocation9], %s2935_s26  ;;  %p3192_p3 = scmp.eq.s32.totalorder %s2772_s27, 0 }
  0x90   : > { %2625 = dma.done.wait (%p3192_p3), [#allocation11], 1024   ;;  %p3193_p0 = pmov %p3192_p3 }
  0x92   : > { %2627 = vsyncadd (%p3193_p0), [#allocation11], 4294966272  ;;  %p3194_p13 = pmov %p3193_p0 }
  0x93   : > { %p3195_p9 = pmov %p3193_p0 }
  0x94   : > { %2629 = dma.done.wait (%p3194_p13), [#allocation14], 1024  }
  0x95   : > { %2631 = vsyncadd (%p3195_p9), [#allocation14], 4294966272  ;;  %v2669_v0 = vmov 0.0   ;;  %vm2670_vm0 = vmmov 0   ;;  %v613_v1 = vld [vmem:[#allocation12 + $0x18] sm:$0xff]  ;;  %v612_v2 = vld [vmem:[#allocation12 + $0x10] sm:$0xff] }
  0x96   : > { %2148 = vmatprep.subr.mxu0 %v2669_v0  ;;  %2156 = vmatprep.mubr.msk.f32.mxu0 %vm2670_vm0, %v2669_v0  ;;  %v611_v3 = vld [vmem:[#allocation12 + $0x8] sm:$0xff]  ;;  %v610_v4 = vld [vmem:[#allocation12] sm:$0xff]  ;;  %vm621_vm1 = vcmask 261120   ;;  %v822_v6 = vld [vmem:[#allocation10 + $0x18] sm:$0xff]  ;;  %s2671_s1 = smov 120   ;;  %vm812_vm2 = vcmask 64512  }
  0x97   : > { %2159 = vmatprep.subr.mxu1 %v2669_v0  ;;  %2167 = vmatprep.mubr.msk.f32.mxu1 %vm2670_vm0, %v2669_v0  ;;  %v609_v5 = vld [vmem:[%s513_s12] sm:$0xff]  ;;  %v821_v7 = vld [vmem:[#allocation10 + $0x10] sm:$0xff]  ;;  %v699_v11 = vld [vmem:[#allocation13 + $0x18] sm:$0xff]  ;;  %p596_p11 = scmp.lt.s32.totalorder %s2650_s24, 1  ;;  %s3196_s13 = sld [smem:[#allocation30_spill]]  ;;  %v2672_v35 = vmov 0  }
  0x98   : > { %2149 = vmatpush3.msra.mxu0 %v613_v1  ;;  %v820_v8 = vld [vmem:[#allocation10 + $0x8] sm:$0xff]  ;;  %v819_v9 = vld [vmem:[#allocation10] sm:$0xff]  ;;  %v818_v10 = vld [vmem:[%s504_s18] sm:$0xff]  ;;  %2160 = vmatpush3.msra.mxu1 %v699_v11  ;;  %s2673_s15 = smov 112   ;;  %s2674_s19 = smov 104  }
  0x99   : > { %2150 = vmatprep.subr.mxu0 %v2669_v0  ;;  %2161 = vmatprep.subr.mxu1 %v2669_v0  ;;  %v2090_v14 = vld [vmem:[%s3134_s5] ss:$0 sm:$0xff]  ;;  %v698_v18 = vld [vmem:[#allocation13 + $0x10] sm:$0xff]  ;;  %v696_v22 = vld [vmem:[#allocation13] sm:$0xff]  ;;  %s597_s29 = scalar_select %p596_p11, %s2650_s24, 1 }
  0x9a   : > { %2151 = vmatpush3.msra.mxu0 %v612_v2  ;;  %v2086_v19 = vld [vmem:[%s3136_s7] ss:$0 sm:$0xff]  ;;  %2162 = vmatpush3.msra.mxu1 %v698_v18  ;;  %v695_v23 = vld [vmem:[%s522_s28] sm:$0xff]  ;;  %s3199_s18 = sld [smem:[#allocation26_spill]]  ;;  %s2106_s28 = sshll.u32 %s2650_s24, 7 }
  0x9b   : > { %2152 = vmatprep.subr.mxu0 %v2669_v0  ;;  %2163 = vmatprep.subr.mxu1 %v2669_v0  ;;  %v697_v20 = vld [vmem:[#allocation13 + $0x8] sm:$0xff]  ;;  %s2085_s21 = sshll.u32 %s597_s29, 1  ;;  %s3200_s12 = sld [smem:[#allocation34_spill]] }
  0x9c   : > { %2153 = vmatpush3.msra.mxu0 %v611_v3  ;;  %2164 = vmatpush3.msra.mxu1 %v697_v20  ;;  %v2088_v29 = vld [vmem:[%s3138_s9] ss:$0 sm:$0xff]  ;;  %s595_s27 = scalar_lea.vmem [#allocation16], %s2935_s26  ;;  %s3201_s4 = sld [smem:[#allocation35_spill]] }
  0x9d   : > { %2154 = vmatprep.subr.mxu0 %v2669_v0  ;;  %2165 = vmatprep.subr.mxu1 %v2669_v0  ;;  %s602_s3 = scalar_lea.vmem %s3196_s13, %s2085_s21  ;;  %s1886_s14 = sshll.u32 %s595_s27, 4  ;;  %s1887_s14 = int_to_ptr.vmem [resolvable:$true] %s1886_s14 }
  0x9e   : > { %2155 = vmatpush3.msra.mxu0 %v610_v4  ;;  %2166 = vmatpush3.msra.mxu1 %v696_v22  ;;  %v904_v34 = vld [vmem:[%s602_s3] sm:$0x3]  ;;  %v1071_v4 = vld [vmem:[#allocation15] sm:$0xff]  ;;  %s1872_s16 = scalar_lea.sflag [#allocation6], %s2932_s30  ;;  %s2566_s29 = scalar_lea.vmem %s1887_s14, 128 }
  0x9f   : > { %2157 = vmatmul.mubr.msk.f32.vlgmr.msra.gmra.mxu0 %vm621_vm1, %v609_v5  ;;  %2170 = vmatprep.subr.mxu0 %v2669_v0  ;;  %vm905_vm3 = vnez %v904_v34  ;;  %v1237_v5 = vld [vmem:[#allocation15 + $0x8] sm:$0xff]  ;;  %p2567_p12 = scmp.ne.s32.totalorder %s1887_s14, %s2566_s29  ;;  %s2675_s21 = smov [#allocation16]  }
  0xa0   : > { %2171 = vmatpush3.msra.mxu0 %v822_v6  ;;  %2178 = vmatprep.mubr.msk.f32.mxu0 %vm2670_vm0, %v2669_v0  ;;  %v982_v36 = vsel %vm905_vm3, 16843009, %v2672_v35  ;;  %p3202_p2 = scmp.ne.s32.totalorder %s3199_s18, 0  ;;  %s2570_s24 = sshll.u32 %s2675_s21, 4  ;;  %s2571_s24 = int_to_ptr.vmem [resolvable:$false] %s2570_s24 }
  0xa1   : > { %2172 = vmatprep.subr.mxu0 %v2669_v0  ;;  %2168 = vmatmul.mubr.msk.f32.vlgmr.msra.gmra.mxu1 %vm621_vm1, %v695_v23  ;;  %v983_v37 = vunpack.c.0.s8 %v982_v36  ;;  %s2572_s26 = scalar_lea.vmem %s2571_s24, 256  ;;  %p2573_p1 = scmp.lt.s32.totalorder %s1887_s14, %s2571_s24 }
  0xa2   : > { %2173 = vmatpush3.msra.mxu0 %v821_v7  ;;  %2181 = vmatprep.subr.mxu1 %v2669_v0  ;;  %s1884_s11 = scalar_lea.hbm %s3201_s4, %s2106_s28  ;;  %p2568_p5 = pnand %p2567_p12, %p3202_p2 }
  0xa3   : > { %2174 = vmatprep.subr.mxu0 %v2669_v0  ;;  %2183 = vmatprep.mubr.msk.f32.mxu1 %vm2670_vm0, %v2669_v0  ;;  %vm3023_vm4 = vcmp.ne.s32.totalorder %v983_v37, 0  ;;  %p2574_p7 = scmp.lt.s32.totalorder %s2572_s26, %s2566_s29 }
  0xa4   : > { %2175 = vmatpush3.msra.mxu0 %v820_v8  ;;  %p2569_p10 = pneg %p2568_p5 }
  0xa5   : > { %2176 = vmatprep.subr.mxu0 %v2669_v0  ;;  %p2575_p4 = por %p2574_p7, %p2573_p1 }
  0xa6   : > { %2177 = vmatpush3.msra.mxu0 %v819_v9 }
  0xa7   : > { %2179 = vmatmul.mubr.msk.f32.vlgmr.msra.gmra.mxu0 %vm621_vm1, %v818_v10  ;;  %2191 = vmatprep.subr.mxu0 %v2669_v0  ;;  %p2576_p8 = pnand %p2575_p4, %p2569_p10 }
  0xa8   : > { %2193 = vmatprep.mubr.msk.f32.mxu0 %vm2670_vm0, %v2669_v0 }
 0x15f   : > { %v691_v12 = vpop.f32.mrf.mxu0 }
 0x160   : > { %v692_v21 = vadd.f32 %v2086_v19, %v691_v12 }
 0x161   : > { %v2158_v13 = vpop.f32.mrf.mxu0  ;;  %v776_v30 = vpop.f32.mrf.mxu1 }
 0x162   : > { %v777_v31 = vadd.f32 %v2088_v29, %v776_v30 }
 0x163   : > { %v2169_v32 = vpop.f32.mrf.mxu1 }
 0x164   : > { %817 = vst.msk [vmem:[#allocation3] sm:$0xff] %vm621_vm1, %v777_v31 }
 0x167   : > { %v900_v15 = vpop.f32.mrf.mxu0 }
 0x168   : > { %v2984_v16 = vadd.f32 %v2090_v14, %v900_v15 }
 0x169   : > { %v2180_v17 = vpop.f32.mrf.mxu0 }
 0x16a   : > { %1073 = vrot.lane.b32.xlu0 %v2984_v16, %s2671_s1 }
 0x16b   : > { %v3014_v33 = vld [vmem:[#allocation3] sm:$0xff] }
 0x188   : > { %780 = vxpose.xlu0.b32.start.end [1/1] (short) (narrow) %v692_v21, 32 }
 0x1dc   : > { %v1074_v24 = vpop.permute.xlu0 %1073 }
 0x204   : > { %v796_v25 = vpop.trf.xlu0 }
 0x205   : > { %813 = vst.msk [vmem:[#allocation2] sm:$0xff] %vm812_vm2, %v796_v25 }
 0x208   : > { %v797_v26 = vpop.trf.xlu0 }
 0x209   : > { %814 = vst.msk [vmem:[#allocation2 + $0x8] sm:$0xff] %vm812_vm2, %v797_v26 }
 0x20c   : > { %v906_v27 = vld [vmem:[#allocation2] sm:$0xff]  ;;  %v798_v59 = vpop.trf.xlu0 }
 0x20d   : > { %2182 = vmatpush3.msra.mxu1 %v906_v27  ;;  %815 = vst.msk [vmem:[#allocation2 + $0x10] sm:$0xff] %vm812_vm2, %v798_v59 }
 0x20e   : > { %2184 = vmatmul.mubr.msk.f32.vlgmr.msra.gmra.mxu1 %vm812_vm2, %v2984_v16  ;;  %2186 = vmatprep.subr.mxu1 %v2669_v0 }
 0x20f   : > { %2188 = vmatprep.mubr.msk.f32.mxu1 %vm2670_vm0, %v2669_v0  ;;  %2187 = vmatpush3.msra.mxu1 %v3014_v33 }
 0x210   : > { %v1072_v28 = vld [vmem:[#allocation2 + $0x8] sm:$0xff]  ;;  %2196 = vmatprep.subr.mxu1 %v2669_v0  ;;  %v799_v13 = vpop.trf.xlu0 }
 0x211   : > { %2192 = vmatpush3.msra.mxu0 %v1072_v28  ;;  %816 = vst.msk [vmem:[#allocation2 + $0x18] sm:$0xff] %vm812_vm2, %v799_v13 }
 0x212   : > { %2194 = vmatmul.mubr.msk.f32.vlgmr.msra.gmra.mxu0 %vm812_vm2, %v1074_v24  ;;  %2201 = vmatprep.subr.mxu0 %v2669_v0 }
 0x213   : > { %2203 = vmatprep.mubr.msk.f32.mxu0 %vm2670_vm0, %v2669_v0  ;;  %2202 = vmatpush3.msra.mxu0 %v1237_v5 }
 0x214   : > { %2211 = vmatprep.subr.mxu0 %v2669_v0  ;;  %v1384_v10 = vld [vmem:[#allocation2 + $0x10] sm:$0xff] }
 0x218   : > { %v1623_v34 = vld [vmem:[#allocation2 + $0x18] sm:$0xff] }
 0x2ce   : > { %v977_v38 = vpop.f32.mrf.mxu1 }
 0x2cf   : > { %v981_v40 = vmul.f32 0.35355338, %v977_v38 }
 0x2d0   : > { %v2185_v41 = vpop.f32.mrf.mxu1 }
 0x2d1   : > { %v985_v42 = vsel %vm3023_vm4, -1e+09, %v981_v40 }
 0x2d2   : > { %v1143_v43 = vpop.f32.mrf.mxu0  ;;  %v986_v44 = vsel %vm812_vm2, %v985_v42, -inf }
 0x2d3   : > { %v1147_v45 = vmul.f32 0.35355338, %v1143_v43  ;;  %987 = vmax.xlane.f32.xlu1 %v986_v44 }
 0x2d4   : > { %v2195_v46 = vpop.f32.mrf.mxu0 }
 0x2d5   : > { %v1148_v47 = vsel %vm3023_vm4, -1e+09, %v1147_v45 }
 0x2d6   : > { %v1149_v48 = vsel %vm812_vm2, %v1148_v47, -inf }
 0x2d7   : > { %1150 = vmax.xlane.f32.xlu1 %v1149_v48 }
 0x35c   : > { %v988_v49 = vpop.xlane.xlu1 %987 }
 0x35d   : > { %v989_v50 = vsub.f32 %v985_v42, %v988_v49 }
 0x35f   : > { %v990_v51 = vmul.f32 1.442695, %v989_v50 }
 0x360   : > { %v1151_v52 = vpop.xlane.xlu1 %1150 }
 0x361   : > { %2362 = vpow2.f32 %v990_v51  ;;  %v1152_v53 = vsub.f32 %v1148_v47, %v1151_v52 }
 0x363   : > { %v1153_v54 = vmul.f32 1.442695, %v1152_v53 }
 0x365   : > { %2364 = vpow2.f32 %v1153_v54 }
 0x36e   : > { %v2363_v55 = vpop.eup %2362 }
 0x36f   : > { %v992_v56 = vsel %vm812_vm2, %v2363_v55, 0.0 }
 0x370   : > { %993 = vadd.xlane.f32.xlu1 %v992_v56 }
 0x372   : > { %v2365_v57 = vpop.eup %2364 }
 0x373   : > { %v1155_v58 = vsel %vm812_vm2, %v2365_v57, 0.0 }
 0x374   : > { %1156 = vadd.xlane.f32.xlu1 %v1155_v58 }
 0x385   : > { %1161 = vrot.lane.b32.xlu1 %v3014_v33, %s2671_s1 }
 0x389   : > { %1385 = vrot.lane.b32.xlu1 %v2984_v16, %s2673_s15 }
 0x38d   : > { %1472 = vrot.lane.b32.xlu1 %v3014_v33, %s2673_s15 }
 0x3f9   : > { %v994_v60 = vpop.xlane.xlu1 %993 }
 0x3fa   : > { %2366 = vrcp.f32 %v994_v60 }
 0x3fd   : > { %v1157_v61 = vpop.xlane.xlu1 %1156 }
 0x3fe   : > { %2368 = vrcp.f32 %v1157_v61 }
 0x401   : > { %v1162_v1 = vpop.permute.xlu1 %1161 }
 0x405   : > { %v1386_v6 = vpop.permute.xlu1 %1385 }
 0x407   : > { %v2367_v62 = vpop.eup %2366 }
 0x408   : > { %v996_v63 = vmul.f32 %v2367_v62, %v2363_v55 }
 0x409   : > { %v1473_v8 = vpop.permute.xlu1 %1472 }
 0x40a   : > { %2189 = vmatmul.mubr.msk.f32.vlgmr.msra.gmra.mxu1 %vm812_vm2, %v996_v63 }
 0x40b   : > { %v2369_v2 = vpop.eup %2368  ;;  %2197 = vmatpush3.msra.mxu1 %v1162_v1  ;;  %2198 = vmatprep.mubr.msk.f32.mxu1 %vm2670_vm0, %v2669_v0 }
 0x40c   : > { %v1159_v3 = vmul.f32 %v2369_v2, %v2365_v57  ;;  %2206 = vmatprep.subr.mxu1 %v2669_v0  ;;  %v2104_v57 = vld [vmem:[%s3200_s12] ss:$0 sm:$0xff] }
 0x40e   : > { %2199 = vmatmul.mubr.msk.f32.vlgmr.msra.gmra.mxu1 %vm812_vm2, %v1159_v3 }
 0x40f   : > { %2207 = vmatpush3.msra.mxu1 %v1071_v4  ;;  %2208 = vmatprep.mubr.msk.f32.mxu1 %vm2670_vm0, %v2669_v0 }
 0x410   : > { %2216 = vmatprep.subr.mxu1 %v2669_v0 }
 0x4ca   : > { %v1067_v7 = vpop.f32.mrf.mxu1 }
 0x4cb   : > { %2209 = vmatmul.mubr.msk.f32.vlgmr.msra.gmra.mxu1 %vm812_vm2, %v1067_v7 }
 0x4cc   : > { %2217 = vmatpush3.msra.mxu1 %v1473_v8  ;;  %v2190_v9 = vpop.f32.mrf.mxu1  ;;  %2218 = vmatprep.mubr.msk.f32.mxu1 %vm2670_vm0, %v2669_v0 }
 0x4cd   : > { %2226 = vmatprep.subr.mxu1 %v2669_v0 }
 0x4ce   : > { %v1233_v11 = vpop.f32.mrf.mxu1 }
 0x4cf   : > { %2204 = vmatmul.mubr.msk.f32.vlgmr.msra.gmra.mxu0 %vm812_vm2, %v1233_v11 }
 0x4d0   : > { %v2200_v12 = vpop.f32.mrf.mxu1  ;;  %2212 = vmatpush3.msra.mxu0 %v1384_v10  ;;  %2213 = vmatprep.mubr.msk.f32.mxu0 %vm2670_vm0, %v2669_v0 }
 0x4d1   : > { %2221 = vmatprep.subr.mxu0 %v2669_v0 }
 0x4d3   : > { %2214 = vmatmul.mubr.msk.f32.vlgmr.msra.gmra.mxu0 %vm812_vm2, %v1386_v6 }
 0x4d4   : > { %2223 = vmatprep.mubr.msk.f32.mxu0 %vm2670_vm0, %v2669_v0 }
 0x58b   : > { %v1380_v14 = vpop.f32.mrf.mxu1 }
 0x58d   : > { %v2210_v15 = vpop.f32.mrf.mxu1 }
 0x58f   : > { %v1307_v17 = vpop.f32.mrf.mxu0 }
 0x590   : > { %v1381_v18 = vadd.f32 %v1380_v14, %v1307_v17 }
 0x591   : > { %v2205_v19 = vpop.f32.mrf.mxu0 }
 0x593   : > { %v1455_v20 = vpop.f32.mrf.mxu0 }
 0x594   : > { %v1459_v21 = vmul.f32 0.35355338, %v1455_v20 }
 0x595   : > { %v2215_v22 = vpop.f32.mrf.mxu0 }
 0x596   : > { %v1460_v23 = vsel %vm3023_vm4, -1e+09, %v1459_v21 }
 0x597   : > { %v1461_v24 = vsel %vm812_vm2, %v1460_v23, -inf }
 0x598   : > { %1462 = vmax.xlane.f32.xlu0 %v1461_v24 }
 0x621   : > { %v1463_v25 = vpop.xlane.xlu0 %1462 }
 0x622   : > { %v1464_v26 = vsub.f32 %v1460_v23, %v1463_v25 }
 0x624   : > { %v1465_v27 = vmul.f32 1.442695, %v1464_v26 }
 0x626   : > { %2370 = vpow2.f32 %v1465_v27 }
 0x633   : > { %v2371_v28 = vpop.eup %2370 }
 0x634   : > { %v1467_v29 = vsel %vm812_vm2, %v2371_v28, 0.0 }
 0x635   : > { %1468 = vadd.xlane.f32.xlu1 %v1467_v29 }
 0x646   : > { %1624 = vrot.lane.b32.xlu1 %v2984_v16, %s2674_s19  ;;  %v1548_v16 = vld [vmem:[#allocation15 + $0x10] sm:$0xff] }
 0x647   : > { %2222 = vmatpush3.msra.mxu0 %v1548_v16 }
 0x648   : > { %2231 = vmatprep.subr.mxu0 %v2669_v0 }
 0x6be   : > { %v1469_v30 = vpop.xlane.xlu1 %1468 }
 0x6bf   : > { %2372 = vrcp.f32 %v1469_v30 }
 0x6c2   : > { %v1625_v35 = vpop.permute.xlu1 %1624 }
 0x6cc   : > { %v2373_v31 = vpop.eup %2372 }
 0x6cd   : > { %v1471_v32 = vmul.f32 %v2373_v31, %v2371_v28 }
 0x6cf   : > { %2219 = vmatmul.mubr.msk.f32.vlgmr.msra.gmra.mxu1 %vm812_vm2, %v1471_v32 }
 0x6d0   : > { %2227 = vmatpush3.msra.mxu1 %v1623_v34  ;;  %2228 = vmatprep.mubr.msk.f32.mxu1 %vm2670_vm0, %v2669_v0 }
 0x6d1   : > { %2236 = vmatprep.subr.mxu1 %v2669_v0 }
 0x6d3   : > { %2229 = vmatmul.mubr.msk.f32.vlgmr.msra.gmra.mxu1 %vm812_vm2, %v1625_v35 }
 0x6d4   : > { %2238 = vmatprep.mubr.msk.f32.mxu1 %vm2670_vm0, %v2669_v0 }
 0x78f   : > { %v1544_v36 = vpop.f32.mrf.mxu1 }
 0x790   : > { %2224 = vmatmul.mubr.msk.f32.vlgmr.msra.gmra.mxu0 %vm812_vm2, %v1544_v36 }
 0x791   : > { %v2220_v37 = vpop.f32.mrf.mxu1  ;;  %2233 = vmatprep.mubr.msk.f32.mxu0 %vm2670_vm0, %v2669_v0 }
 0x793   : > { %v1694_v38 = vpop.f32.mrf.mxu1 }
 0x794   : > { %v1698_v40 = vmul.f32 0.35355338, %v1694_v38 }
 0x795   : > { %v2230_v41 = vpop.f32.mrf.mxu1 }
 0x796   : > { %v1699_v42 = vsel %vm3023_vm4, -1e+09, %v1698_v40 }
 0x797   : > { %v1700_v43 = vsel %vm812_vm2, %v1699_v42, -inf }
 0x798   : > { %1701 = vmax.xlane.f32.xlu0 %v1700_v43 }
 0x7ae   : > { %1711 = vrot.lane.b32.xlu0 %v3014_v33, %s2674_s19  ;;  %v1787_v33 = vld [vmem:[#allocation15 + $0x18] sm:$0xff] }
 0x7af   : > { %2237 = vmatpush3.msra.mxu1 %v1787_v33 }
 0x821   : > { %v1702_v44 = vpop.xlane.xlu0 %1701 }
 0x822   : > { %v1703_v45 = vsub.f32 %v1699_v42, %v1702_v44 }
 0x824   : > { %v1704_v46 = vmul.f32 1.442695, %v1703_v45 }
 0x825   : > { %v1712_v47 = vpop.permute.xlu0 %1711 }
 0x826   : > { %2374 = vpow2.f32 %v1704_v46  ;;  %2232 = vmatpush3.msra.mxu0 %v1712_v47 }
 0x833   : > { %v2375_v48 = vpop.eup %2374 }
 0x834   : > { %v1706_v0 = vsel %vm812_vm2, %v2375_v48, 0.0 }
 0x835   : > { %1707 = vadd.xlane.f32.xlu1 %v1706_v0 }
 0x850   : > { %v1618_v49 = vpop.f32.mrf.mxu0 }
 0x851   : > { %v1622_v39 = vadd.f32 %v1618_v49, %v1381_v18 }
 0x852   : > { %v2225_v50 = vpop.f32.mrf.mxu0 }
 0x8be   : > { %v1708_v51 = vpop.xlane.xlu1 %1707 }
 0x8bf   : > { %2376 = vrcp.f32 %v1708_v51 }
 0x8cc   : > { %v2377_v52 = vpop.eup %2376 }
 0x8cd   : > { %v1710_v53 = vmul.f32 %v2377_v52, %v2375_v48 }
 0x8cf   : > { %2234 = vmatmul.mubr.msk.f32.vlgmr.msra.gmra.mxu0 %vm812_vm2, %v1710_v53 }
 0x98f   : > { %v1783_v54 = vpop.f32.mrf.mxu0 }
 0x990   : > { %2239 = vmatmul.mubr.msk.f32.vlgmr.msra.gmra.mxu1 %vm812_vm2, %v1783_v54 }
 0x991   : > { %v2235_v55 = vpop.f32.mrf.mxu0 }
 0xa50   : > { %v1857_v56 = vpop.f32.mrf.mxu1 }
 0xa51   : > { %v1861_v58 = vadd.f32 %v1857_v56, %v1622_v39 }
 0xa52   : > { %v2240_v59 = vpop.f32.mrf.mxu1 }
 0xa53   : > { %v1869_v60 = vadd.f32 %v2104_v57, %v1861_v58 }
 0xa55   : > { %1870 = vst.msk [vmem:[%s595_s27] sm:$0xff] %vm621_vm1, %v1869_v60 }
 0xa56   : > { %2579 = shalt.err (!%p2576_p8)
}
 0xa57   : > { %s2580_s17 = scalar_lea.hbm %s1884_s11, 128  ;;  %s2584_s13 = scalar_lea.hbm %s3201_s4, 256 }
 0xa58   : > { %p2581_p6 = scmp.ne.s32.totalorder %s1884_s11, %s2580_s17  ;;  %p2585_p13 = scmp.lt.s32.totalorder %s1884_s11, %s3201_s4 }
 0xa59   : > { %p2586_p9 = scmp.lt.s32.totalorder %s2584_s13, %s2580_s17 }
 0xa5a   : > { %p2582_p3 = pnand %p2581_p6, %p3202_p2 }
 0xa5b   : > { %p2587_p11 = por %p2586_p9, %p2585_p13 }
 0xa5c   : > { %p2583_p0 = pneg %p2582_p3 }
 0xa5e   : > { %p2588_p12 = pnand %p2587_p11, %p2583_p0 }
 0xa60   : > { %2591 = shalt.err (!%p2588_p12)
}
 0xa61   : > { %2263 = dma.vmem_to_hbm [thread:$0]  (%p3202_p2), %s1887_s14, 128, %s1884_s11, %s1872_s16  }
 0xa62 PF: > { %s3203_s19 = sld [smem:[#allocation22_spill]] }
 0xa63   : > { %s3204_s6 = sld [smem:[#allocation28_spill]] }
 0xa64   : > { %s3205_s8 = sld [smem:[#allocation24_spill]] }
 0xa68   : > { %s1898_s12 = sand.u32 1, %s3203_s19  }
 0xa69   : > { %p3206_p5 = scmp.ne.s32.totalorder %s3204_s6, 0  ;;  %s1899_s28 = scalar_lea.sflag [#allocation6], %s1898_s12 }
 0xa6a   : > { %p3207_p10 = scmp.ge.s32.totalorder %s3205_s8, 2 }
 0xa6c   : > { %p2289_p1 = pnand %p3207_p10, %p3206_p5 }
 0xa6e   : > { %p2290_p7 = pneg %p2289_p1 }
 0xa70   : > { %2633 = dma.done.wait (%p2290_p7), %s1899_s28, 128  }
 0xa71   : > { %2635 = vsyncadd (%p2290_p7), %s1899_s28, 4294967168  ;;  %s33_s26 = sadd.s32 1, %s3205_s8   ;;  %s3208_s27 = sld [smem:[#allocation27_spill]] }
 0xa72   : > { %p30_p4 = scmp.ge.s32.totalorder %s33_s26, 4   ;;  %s3209_s24 = sld [smem:[#allocation23_spill]] }
 0xa73   : > { %s3210_s25 = sld [smem:[#allocation25_spill]]  ;;  %s3211_s21 = smov %s2642_s22 }
 0xa74   : > { %s3212_s22 = smov %s2646_s23  ;;  %32 = sbr.rel (!%p30_p4) target bundleno = 18 (0x12), region = 160 }
 0xa77   : > { %s3213_s23 = smov %s3208_s27 }
 0xa79   :  { %1904 = vsyncpa [#allocation5], 1 }
 0xa7a   :  { %1906 = vsyncpa [#allocation5 + $0x1], 1 }
 0xa7b   :  { %1907 = vsyncpa [#allocation8], 1 }
 0xa7c   :  { %1909 = vsyncpa [#allocation8 + $0x1], 1 }
 0xa7d   :  { %1910 = vsyncpa [#allocation11], 1 }
 0xa7e   :  { %1911 = vsyncpa [#allocation14], 1 }
 0xa7f   :  { %1912 = vsyncpa [#allocation6], 1 }
 0xa80   :  { %1914 = vsyncpa [#allocation6 + $0x1], 1 }

</bundles_post_ra>
